<compile_context>
chip_gen: v7x
topology: tpu7x:2x2x1
jax: 0.10.0
libtpu: 0.0.40
codegen_flags: <defaults>
</compile_context>

<pallas_src>
import math
import numpy as np
import jax
import jax.numpy as jnp
from jax.experimental import pallas as pl
from jax.experimental.pallas import tpu as pltpu

# ------------------------- configuration -----------------------------------
B_SZ   = 2            # batch
L_SEQ  = 64           # tokens per batch (e.g. 8x8 patches)
C_IN   = 128          # in_features  (lane-dense)
HIDDEN = 256          # hidden_features (lane-dense)
TM     = 128          # row tile: B_SZ * L_SEQ == 128 fills the MXU M dim


# ------------------------- exact GELU (erf) ---------------------------------
def _erf_approx(x):
    # Abramowitz & Stegun 7.1.26, |err| <= 1.5e-7, valid for all x via symmetry.
    a1, a2, a3, a4, a5 = (0.254829592, -0.284496736, 1.421413741,
                          -1.453152027, 1.061405429)
    p = 0.3275911
    z = jnp.abs(x)
    t = 1.0 / (1.0 + p * z)
    poly = ((((a5 * t + a4) * t + a3) * t + a2) * t + a1) * t
    y = 1.0 - poly * jnp.exp(-z * z)
    return jnp.where(x >= 0.0, y, -y)


def _gelu_exact(x):
    # nn.GELU() default: 0.5 * x * (1 + erf(x / sqrt(2)))
    return 0.5 * x * (1.0 + _erf_approx(x * 0.7071067811865476))


# ------------------------- fused MLP kernel ---------------------------------
def mlp_kernel(x_ref, w1_ref, w2_ref, b_ref, o_ref):
    x = x_ref[...]                                               # (TM, C_IN)
    h = (jnp.dot(x, w1_ref[...], preferred_element_type=jnp.float32)
         + b_ref[:, :HIDDEN])                                    # (TM, HIDDEN)
    a = _gelu_exact(h)                                           # GELU (exact)
    o_ref[...] = (jnp.dot(a, w2_ref[...],
                          preferred_element_type=jnp.float32)
                  + b_ref[:, HIDDEN:])                           # (TM, C_IN)


def mlp_forward(x, params):
    B, L, C = x.shape
    rows = B * L
    xr = x.reshape(rows, C)
    n_tiles = -(-rows // TM)                                     # ceil div
    pad = n_tiles * TM - rows
    if pad:
        xr = jnp.pad(xr, ((0, pad), (0, 0)))

    out = pl.pallas_call(
        mlp_kernel,
        out_shape=jax.ShapeDtypeStruct((n_tiles * TM, C), jnp.float32),
        grid=(n_tiles,),
        in_specs=[
            pl.BlockSpec((TM, C_IN), lambda i: (i, 0)),          # activations
            pl.BlockSpec((C_IN, HIDDEN), lambda i: (0, 0)),      # fc1 weight.T
            pl.BlockSpec((HIDDEN, C_IN), lambda i: (0, 0)),      # fc2 weight.T
            pl.BlockSpec((1, HIDDEN + C_IN), lambda i: (0, 0)),  # packed biases
        ],
        out_specs=pl.BlockSpec((TM, C_IN), lambda i: (i, 0)),
        compiler_params=pltpu.CompilerParams(
            dimension_semantics=("parallel",)),                  # v7x: shard rows
    )(xr, params['w1'], params['w2'], params['b'])

    return out[:rows].reshape(B, L, C)


# ------------------------- parameters (nn.Linear defaults) ------------------
def init_params(key):
    k1, k2, k3, k4 = jax.random.split(key, 4)
    bound1 = 1.0 / math.sqrt(C_IN)
    bound2 = 1.0 / math.sqrt(HIDDEN)
    w1 = jax.random.uniform(k1, (C_IN, HIDDEN), jnp.float32, -bound1, bound1)
    b1 = jax.random.uniform(k2, (1, HIDDEN), jnp.float32, -bound1, bound1)
    w2 = jax.random.uniform(k3, (HIDDEN, C_IN), jnp.float32, -bound2, bound2)
    b2 = jax.random.uniform(k4, (1, C_IN), jnp.float32, -bound2, bound2)
    # Pack both biases into one lane-dense slab (fewer DMA descriptors/step).
    return {'w1': w1, 'w2': w2, 'b': jnp.concatenate([b1, b2], axis=-1)}


# ------------------------- pure-JAX reference --------------------------------
def reference_forward(x, params):
    B, L, C = x.shape
    h = x.reshape(-1, C) @ params['w1'] + params['b'][:, :HIDDEN]
    a = jax.nn.gelu(h, approximate=False)                        # exact GELU
    o = a @ params['w2'] + params['b'][:, HIDDEN:]
    return o.reshape(B, L, C)


# ------------------------- main ----------------------------------------------
if __name__ == "__main__":
    key = jax.random.PRNGKey(0)
    kx, kp = jax.random.split(key)
    x = jax.random.normal(kx, (B_SZ, L_SEQ, C_IN), jnp.float32)
    params = init_params(kp)

    out = jax.jit(mlp_forward)(x, params)
    out = jax.block_until_ready(out)

    ref = reference_forward(x, params)
    np.testing.assert_allclose(np.asarray(out), np.asarray(ref),
                               rtol=2e-3, atol=2e-3)
    print("KERNEL_OK")
</pallas_src>

<mosaic_0001>
module attributes {stable_mosaic.version = 11 : i64} {
  func.func @mlp_kernel(%arg0: i32, %arg1: memref<128x128xf32, #tpu.memory_space<vmem>>, %arg2: memref<128x256xf32, #tpu.memory_space<vmem>>, %arg3: memref<256x128xf32, #tpu.memory_space<vmem>>, %arg4: memref<1x384xf32, #tpu.memory_space<vmem>>, %arg5: memref<128x128xf32, #tpu.memory_space<vmem>>) attributes {dimension_semantics = [#tpu.dimension_semantics<parallel>], iteration_bounds = array<i64: 1>, scalar_prefetch = 0 : i64, scratch_operands = 0 : i64, tpu.core_type = #tpu.core_type<tc>, window_params = [{transform_indices = @transform_0, window_bounds = array<i64: 128, 128>}, {pipeline_mode = #tpu.pipeline_mode<synchronous>, transform_indices = @transform_1, window_bounds = array<i64: 128, 256>}, {pipeline_mode = #tpu.pipeline_mode<synchronous>, transform_indices = @transform_2, window_bounds = array<i64: 256, 128>}, {pipeline_mode = #tpu.pipeline_mode<synchronous>, transform_indices = @transform_3, window_bounds = array<i64: 1, 384>}, {transform_indices = @transform_4, window_bounds = array<i64: 128, 128>}]} {
    %c0 = arith.constant 0 : index
    %c0_0 = arith.constant 0 : index
    %0 = vector.load %arg1[%c0, %c0_0] : memref<128x128xf32, #tpu.memory_space<vmem>>, vector<128x128xf32>
    %c0_1 = arith.constant 0 : index
    %c0_2 = arith.constant 0 : index
    %1 = vector.load %arg2[%c0_1, %c0_2] : memref<128x256xf32, #tpu.memory_space<vmem>>, vector<128x256xf32>
    %cst = arith.constant dense<0.000000e+00> : vector<128x256xf32>
    %2 = tpu.matmul %0, %1, %cst {dimension_numbers = #tpu.dot_dimension_numbers<[1], [0], [0], [1], [0, 0, 1, 1], [], []>} : vector<128x128xf32>, vector<128x256xf32>, vector<128x256xf32> -> vector<128x256xf32>
    %c0_3 = arith.constant 0 : index
    %c0_4 = arith.constant 0 : index
    %3 = vector.load %arg4[%c0_3, %c0_4] : memref<1x384xf32, #tpu.memory_space<vmem>>, vector<1x256xf32>
    %4 = vector.broadcast %3 : vector<1x256xf32> to vector<128x256xf32>
    %5 = arith.addf %2, %4 : vector<128x256xf32>
    %cst_5 = arith.constant 5.000000e-01 : f32
    %6 = vector.broadcast %cst_5 : f32 to vector<128x256xf32>
    %7 = arith.mulf %6, %5 : vector<128x256xf32>
    %cst_6 = arith.constant 0.707106769 : f32
    %8 = vector.broadcast %cst_6 : f32 to vector<128x256xf32>
    %9 = arith.mulf %5, %8 : vector<128x256xf32>
    %10 = math.absf %9 : vector<128x256xf32>
    %cst_7 = arith.constant 0.327591091 : f32
    %11 = vector.broadcast %cst_7 : f32 to vector<128x256xf32>
    %12 = arith.mulf %11, %10 : vector<128x256xf32>
    %cst_8 = arith.constant 1.000000e+00 : f32
    %13 = vector.broadcast %cst_8 : f32 to vector<128x256xf32>
    %14 = arith.addf %13, %12 : vector<128x256xf32>
    %cst_9 = arith.constant 1.000000e+00 : f32
    %15 = vector.broadcast %cst_9 : f32 to vector<128x256xf32>
    %16 = arith.divf %15, %14 : vector<128x256xf32>
    %cst_10 = arith.constant 1.06140542 : f32
    %17 = vector.broadcast %cst_10 : f32 to vector<128x256xf32>
    %18 = arith.mulf %17, %16 : vector<128x256xf32>
    %cst_11 = arith.constant -1.45315206 : f32
    %19 = vector.broadcast %cst_11 : f32 to vector<128x256xf32>
    %20 = arith.addf %18, %19 : vector<128x256xf32>
    %21 = arith.mulf %20, %16 : vector<128x256xf32>
    %cst_12 = arith.constant 1.42141378 : f32
    %22 = vector.broadcast %cst_12 : f32 to vector<128x256xf32>
    %23 = arith.addf %21, %22 : vector<128x256xf32>
    %24 = arith.mulf %23, %16 : vector<128x256xf32>
    %cst_13 = arith.constant -0.284496725 : f32
    %25 = vector.broadcast %cst_13 : f32 to vector<128x256xf32>
    %26 = arith.addf %24, %25 : vector<128x256xf32>
    %27 = arith.mulf %26, %16 : vector<128x256xf32>
    %cst_14 = arith.constant 0.254829586 : f32
    %28 = vector.broadcast %cst_14 : f32 to vector<128x256xf32>
    %29 = arith.addf %27, %28 : vector<128x256xf32>
    %30 = arith.mulf %29, %16 : vector<128x256xf32>
    %cst_15 = arith.constant 0.000000e+00 : f32
    %31 = vector.broadcast %cst_15 : f32 to vector<128x256xf32>
    %32 = arith.subf %31, %10 : vector<128x256xf32>
    %33 = arith.mulf %32, %10 : vector<128x256xf32>
    %34 = math.exp %33 : vector<128x256xf32>
    %35 = arith.mulf %30, %34 : vector<128x256xf32>
    %cst_16 = arith.constant 1.000000e+00 : f32
    %36 = vector.broadcast %cst_16 : f32 to vector<128x256xf32>
    %37 = arith.subf %36, %35 : vector<128x256xf32>
    %cst_17 = arith.constant 0.000000e+00 : f32
    %38 = vector.broadcast %cst_17 : f32 to vector<128x256xf32>
    %39 = arith.cmpf oge, %9, %38 : vector<128x256xf32>
    %cst_18 = arith.constant 0.000000e+00 : f32
    %40 = vector.broadcast %cst_18 : f32 to vector<128x256xf32>
    %41 = arith.subf %40, %37 : vector<128x256xf32>
    %42 = arith.select %39, %37, %41 : vector<128x256xi1>, vector<128x256xf32>
    %cst_19 = arith.constant 1.000000e+00 : f32
    %43 = vector.broadcast %cst_19 : f32 to vector<128x256xf32>
    %44 = arith.addf %43, %42 : vector<128x256xf32>
    %45 = arith.mulf %7, %44 : vector<128x256xf32>
    %c0_20 = arith.constant 0 : index
    %c0_21 = arith.constant 0 : index
    %46 = vector.load %arg3[%c0_20, %c0_21] : memref<256x128xf32, #tpu.memory_space<vmem>>, vector<256x128xf32>
    %cst_22 = arith.constant dense<0.000000e+00> : vector<128x128xf32>
    %47 = tpu.matmul %45, %46, %cst_22 {dimension_numbers = #tpu.dot_dimension_numbers<[1], [0], [0], [1], [0, 0, 1, 1], [], []>} : vector<128x256xf32>, vector<256x128xf32>, vector<128x128xf32> -> vector<128x128xf32>
    %c0_23 = arith.constant 0 : index
    %c256 = arith.constant 256 : index
    %48 = vector.load %arg4[%c0_23, %c256] : memref<1x384xf32, #tpu.memory_space<vmem>>, vector<1x128xf32>
    %49 = vector.broadcast %48 : vector<1x128xf32> to vector<128x128xf32>
    %50 = arith.addf %47, %49 : vector<128x128xf32>
    %c0_24 = arith.constant 0 : index
    %c0_25 = arith.constant 0 : index
    %51 = vector.load %arg5[%c0_24, %c0_25] : memref<128x128xf32, #tpu.memory_space<vmem>>, vector<128x128xf32>
    tpu.vector_store %arg5[%c0_24, %c0_25], %50 {strides = array<i32>} : memref<128x128xf32, #tpu.memory_space<vmem>>, vector<128x128xf32>,
    return
  }
  func.func @transform_0(%arg0: i32) -> (i32, i32) {
    %c0_i32 = arith.constant 0 : i32
    %c0_i32_0 = arith.constant 0 : i32
    return %arg0, %c0_i32 : i32, i32
  }
  func.func @transform_1(%arg0: i32) -> (i32, i32) {
    %c0_i32 = arith.constant 0 : i32
    %c0_i32_0 = arith.constant 0 : i32
    %c0_i32_1 = arith.constant 0 : i32
    return %c0_i32, %c0_i32_0 : i32, i32
  }
  func.func @transform_2(%arg0: i32) -> (i32, i32) {
    %c0_i32 = arith.constant 0 : i32
    %c0_i32_0 = arith.constant 0 : i32
    %c0_i32_1 = arith.constant 0 : i32
    return %c0_i32, %c0_i32_0 : i32, i32
  }
  func.func @transform_3(%arg0: i32) -> (i32, i32) {
    %c0_i32 = arith.constant 0 : i32
    %c0_i32_0 = arith.constant 0 : i32
    %c0_i32_1 = arith.constant 0 : i32
    return %c0_i32, %c0_i32_0 : i32, i32
  }
  func.func @transform_4(%arg0: i32) -> (i32, i32) {
    %c0_i32 = arith.constant 0 : i32
    %c0_i32_0 = arith.constant 0 : i32
    return %arg0, %c0_i32 : i32, i32
  }
}

</mosaic_0001>

<bundles_post_ra>
// kernel: mlp_forward.1
= control target key start
LH: loop header
LB: loop body
LE: loop exit
PB: predicated region body
PF: predicated region fallthrough
CT: control target
= control target key end

     0   :  { %9 = vsyncpa [#allocation3], 0  ;;  %s2628_s0 = inlined_call_operand.hbm [shape: f32[128,128], index: 0, kind: input, shape index: {}]   ;;  %s2629_s1 = inlined_call_operand.hbm [shape: f32[128,256], index: 1, kind: input, shape index: {}]   ;;  %s2630_s2 = inlined_call_operand.hbm [shape: f32[256,128], index: 2, kind: input, shape index: {}]   ;;  %s2631_s3 = inlined_call_operand.vmem [shape: f32[1,384], index: 3, kind: input, shape index: {}]   ;;  %s2632_s4 = inlined_call_operand.hbm [shape: f32[128,128], index: 4, kind: output, shape index: {}]  }
   0x1   :  { %10 = vsyncpa [#allocation6], 0 }
   0x2   :  { %11 = vsyncpa [#allocation4], 0  ;;  %s1738_s15 = smov [#allocation5]   ;;  %s1644_s19 = scalar_lea.hbm %s2629_s1, 4096 }
   0x3   :  { %s29_s16 = sshll.u32 %s1738_s15, 4  ;;  %p1645_p0 = scmp.ne.s32.totalorder %s2629_s1, %s1644_s19  ;;  %s30_s16 = int_to_ptr.vmem [resolvable:$true] %s29_s16 }
   0x4   :  { %p1648_p1 = scmp.lt.u32.totalorder %s1644_s19, %s2629_s1 }
   0x6   :  { %p1650_p2 = pnand %p1648_p1, %p1645_p0 }
   0x8   :  { %1653 = shalt.err (!%p1650_p2)
}
   0x9   :  { %s1654_s24 = scalar_lea.vmem %s30_s16, 4096  ;;  %p1659_p4 = scmp.lt.s32.totalorder %s30_s16, %s30_s16 }
   0xa   :  { %p1655_p3 = scmp.ne.s32.totalorder %s30_s16, %s1654_s24  ;;  %p1660_p5 = scmp.lt.s32.totalorder %s1654_s24, %s1654_s24 }
   0xc   :  { %p1661_p6 = por %p1660_p5, %p1659_p4 }
   0xe   :  { %p1662_p7 = pnand %p1661_p6, %p1655_p3 }
  0x10   :  { %1665 = shalt.err (!%p1662_p7)
}
  0x11   :  { %s1739_s25 = smov 256   ;;  %s1740_s26 = smov 16  }
  0x12   :  { %35 = dma.hbm_to_vmem [thread:$0]  %s2629_s1, 4096, %s30_s16, [#allocation6], %s1739_s25, %s1739_s25, %s1740_s26  }
  0x13   :  { %s1741_s29 = smov [#allocation2]   ;;  %s1666_s7 = scalar_lea.hbm %s2628_s0, 2048 }
  0x14   :  { %s17_s30 = sshll.u32 %s1741_s29, 4  ;;  %p1667_p8 = scmp.ne.s32.totalorder %s2628_s0, %s1666_s7  ;;  %s18_s30 = int_to_ptr.vmem [resolvable:$true] %s17_s30 }
  0x15   :  { %p1670_p9 = scmp.lt.u32.totalorder %s1666_s7, %s2628_s0 }
  0x17   :  { %p1672_p10 = pnand %p1670_p9, %p1667_p8 }
  0x19   :  { %1675 = shalt.err (!%p1672_p10)
}
  0x1a   :  { %s1676_s12 = scalar_lea.vmem %s18_s30, 2048  ;;  %p1681_p12 = scmp.lt.s32.totalorder %s18_s30, %s18_s30 }
  0x1b   :  { %p1677_p11 = scmp.ne.s32.totalorder %s18_s30, %s1676_s12  ;;  %p1682_p13 = scmp.lt.s32.totalorder %s1676_s12, %s1676_s12 }
  0x1d   :  { %p1683_p0 = por %p1682_p13, %p1681_p12 }
  0x1f   :  { %p1684_p1 = pnand %p1683_p0, %p1677_p11 }
  0x21   :  { %1687 = shalt.err (!%p1684_p1)
}
  0x22   :  { %s1742_s1 = smov 128   ;;  %s1743_s13 = smov 8  }
  0x23   :  { %23 = dma.hbm_to_vmem [thread:$0]  %s2628_s0, 2048, %s18_s30, [#allocation3], %s1742_s1, %s1742_s1, %s1743_s13  }
  0x24   :  { %s1744_s16 = smov [#allocation7]   ;;  %s1688_s20 = scalar_lea.hbm %s2630_s2, 4096 }
  0x25   :  { %s41_s17 = sshll.u32 %s1744_s16, 4  ;;  %p1689_p2 = scmp.ne.s32.totalorder %s2630_s2, %s1688_s20  ;;  %s42_s17 = int_to_ptr.vmem [resolvable:$true] %s41_s17 }
  0x26   :  { %p1692_p3 = scmp.lt.u32.totalorder %s1688_s20, %s2630_s2 }
  0x28   :  { %p1694_p4 = pnand %p1692_p3, %p1689_p2 }
  0x2a   :  { %1697 = shalt.err (!%p1694_p4)
}
  0x2b   :  { %s1698_s25 = scalar_lea.vmem %s42_s17, 4096  ;;  %p1703_p6 = scmp.lt.s32.totalorder %s42_s17, %s42_s17 }
  0x2c   :  { %p1699_p5 = scmp.ne.s32.totalorder %s42_s17, %s1698_s25  ;;  %p1704_p7 = scmp.lt.s32.totalorder %s1698_s25, %s1698_s25 }
  0x2e   :  { %p1705_p8 = por %p1704_p7, %p1703_p6 }
  0x30   :  { %p1706_p9 = pnand %p1705_p8, %p1699_p5 }
  0x32   :  { %1709 = shalt.err (!%p1706_p9)
}
  0x33   :  { %47 = dma.hbm_to_vmem [thread:$0]  %s2630_s2, 4096, %s42_s17, [#allocation6], %s1742_s1, %s1742_s1, %s1743_s13  }
  0x34   :  { %1732 = dma.done.wait [#allocation3], 2048  }
  0x35   :  { %1733 = vsyncadd [#allocation3], 4294965248 }
  0x36   :  { %1734 = dma.done.wait [#allocation6], 8192  }
  0x37   :  { %1735 = vsyncadd [#allocation6], 4294959104  ;;  %v1745_v0 = vmov 0.0   ;;  %v76_v1 = vld [vmem:[#allocation5 + $0x8] sm:$0xff]  ;;  %v78_v2 = vld [vmem:[#allocation5 + $0x18] sm:$0xff] }
  0x38   :  { %183 = vmatprep.mubr.f32.mxu0 %v1745_v0  ;;  %v75_v3 = vld [vmem:[#allocation5] sm:$0xff]  ;;  %v1443_v4 = vpack.c.bf16 %v78_v2, %v76_v1  ;;  %v77_v5 = vld [vmem:[#allocation5 + $0x10] sm:$0xff]  ;;  %v80_v6 = vld [vmem:[#allocation5 + $0x28] sm:$0xff] }
  0x39   :  { %v82_v7 = vld [vmem:[#allocation5 + $0x38] sm:$0xff]  ;;  %v1445_v8 = vpack.c.bf16 %v77_v5, %v75_v3  ;;  %v79_v10 = vld [vmem:[#allocation5 + $0x20] sm:$0xff]  ;;  %v81_v11 = vld [vmem:[#allocation5 + $0x30] sm:$0xff] }
  0x3a   :  { %v1447_v9 = vpack.c.bf16 %v82_v7, %v80_v6  ;;  %v84_v12 = vld [vmem:[#allocation5 + $0x48] sm:$0xff]  ;;  %1444 = vmatprep.subr.bf16.mxu0 %v1443_v4  ;;  %v86_v13 = vld [vmem:[#allocation5 + $0x58] sm:$0xff]  ;;  %v1449_v14 = vpack.c.bf16 %v81_v11, %v79_v10  ;;  %v83_v16 = vld [vmem:[#allocation5 + $0x40] sm:$0xff] }
  0x3b   :  { %1446 = vmatpush1.bf16.msra.mxu0 %v1445_v8  ;;  %v1451_v15 = vpack.c.bf16 %v86_v13, %v84_v12  ;;  %v85_v17 = vld [vmem:[#allocation5 + $0x50] sm:$0xff]  ;;  %v88_v18 = vld [vmem:[#allocation5 + $0x68] sm:$0xff]  ;;  %v90_v19 = vld [vmem:[#allocation5 + $0x78] sm:$0xff] }
  0x3c   :  { %1448 = vmatprep.subr.bf16.mxu0 %v1447_v9  ;;  %v1453_v20 = vpack.c.bf16 %v85_v17, %v83_v16  ;;  %v1455_v21 = vpack.c.bf16 %v90_v19, %v88_v18  ;;  %v87_v22 = vld [vmem:[#allocation5 + $0x60] sm:$0xff]  ;;  %v89_v23 = vld [vmem:[#allocation5 + $0x70] sm:$0xff]  ;;  %v92_v24 = vld [vmem:[#allocation5 + $0x88] sm:$0xff] }
  0x3d   :  { %v94_v25 = vld [vmem:[#allocation5 + $0x98] sm:$0xff]  ;;  %v1457_v26 = vpack.c.bf16 %v89_v23, %v87_v22  ;;  %v91_v28 = vld [vmem:[#allocation5 + $0x80] sm:$0xff]  ;;  %v93_v29 = vld [vmem:[#allocation5 + $0x90] sm:$0xff] }
  0x3e   :  { %v1459_v27 = vpack.c.bf16 %v94_v25, %v92_v24  ;;  %v96_v30 = vld [vmem:[#allocation5 + $0xa8] sm:$0xff]  ;;  %v98_v31 = vld [vmem:[#allocation5 + $0xb8] sm:$0xff]  ;;  %v1461_v32 = vpack.c.bf16 %v93_v29, %v91_v28  ;;  %v95_v34 = vld [vmem:[#allocation5 + $0xa0] sm:$0xff] }
  0x3f   :  { %1450 = vmatpush1.bf16.msra.mxu0 %v1449_v14  ;;  %v1463_v33 = vpack.c.bf16 %v98_v31, %v96_v30  ;;  %v97_v35 = vld [vmem:[#allocation5 + $0xb0] sm:$0xff]  ;;  %v100_v36 = vld [vmem:[#allocation5 + $0xc8] sm:$0xff]  ;;  %v102_v37 = vld [vmem:[#allocation5 + $0xd8] sm:$0xff] }
  0x40   :  { %1452 = vmatprep.subr.bf16.mxu0 %v1451_v15  ;;  %v1465_v38 = vpack.c.bf16 %v97_v35, %v95_v34  ;;  %v1467_v39 = vpack.c.bf16 %v102_v37, %v100_v36  ;;  %v99_v40 = vld [vmem:[#allocation5 + $0xc0] sm:$0xff]  ;;  %v101_v41 = vld [vmem:[#allocation5 + $0xd0] sm:$0xff]  ;;  %v104_v42 = vld [vmem:[#allocation5 + $0xe8] sm:$0xff] }
  0x41   :  { %v106_v43 = vld [vmem:[#allocation5 + $0xf8] sm:$0xff]  ;;  %v1469_v44 = vpack.c.bf16 %v101_v41, %v99_v40  ;;  %v103_v46 = vld [vmem:[#allocation5 + $0xe0] sm:$0xff]  ;;  %v105_v47 = vld [vmem:[#allocation5 + $0xf0] sm:$0xff] }
  0x42   :  { %v1471_v45 = vpack.c.bf16 %v106_v43, %v104_v42  ;;  %v1473_v48 = vpack.c.bf16 %v105_v47, %v103_v46  ;;  %v59_v49 = vld [vmem:[#allocation2] sm:$0xff]  ;;  %v60_v50 = vld [vmem:[#allocation2 + $0x8] sm:$0xff]  ;;  %v61_v51 = vld [vmem:[#allocation2 + $0x10] sm:$0xff] }
  0x43   :  { %1454 = vmatpush1.bf16.msra.mxu0 %v1453_v20  ;;  %v62_v52 = vld [vmem:[#allocation2 + $0x18] sm:$0xff]  ;;  %v63_v53 = vld [vmem:[#allocation2 + $0x20] sm:$0xff]  ;;  %v64_v54 = vld [vmem:[#allocation2 + $0x28] sm:$0xff] }
  0x44   :  { %1456 = vmatprep.subr.bf16.mxu0 %v1455_v21  ;;  %v65_v55 = vld [vmem:[#allocation2 + $0x30] sm:$0xff]  ;;  %v66_v56 = vld [vmem:[#allocation2 + $0x38] sm:$0xff]  ;;  %v67_v57 = vld [vmem:[#allocation2 + $0x40] sm:$0xff] }
  0x45   :  { %v68_v58 = vld [vmem:[#allocation2 + $0x48] sm:$0xff]  ;;  %v69_v59 = vld [vmem:[#allocation2 + $0x50] sm:$0xff]  ;;  %v70_v60 = vld [vmem:[#allocation2 + $0x58] sm:$0xff] }
  0x46   :  { %v71_v61 = vld [vmem:[#allocation2 + $0x60] sm:$0xff]  ;;  %v72_v62 = vld [vmem:[#allocation2 + $0x68] sm:$0xff]  ;;  %v73_v63 = vld [vmem:[#allocation2 + $0x70] sm:$0xff] }
  0x47   :  { %1458 = vmatpush1.bf16.msra.mxu0 %v1457_v26  ;;  %v74_v1 = vld [vmem:[#allocation2 + $0x78] sm:$0xff]  ;;  %v1160_v2 = vld [vmem:[#allocation7 + $0x80] sm:$0xff]  ;;  %v1161_v3 = vld [vmem:[#allocation7 + $0x88] sm:$0xff] }
  0x48   :  { %1460 = vmatprep.subr.bf16.mxu0 %v1459_v27  ;;  %v1475_v4 = vpack.c.bf16 %v1161_v3, %v1160_v2  ;;  %v1144_v5 = vld [vmem:[#allocation7] sm:$0xff]  ;;  %v1145_v6 = vld [vmem:[#allocation7 + $0x8] sm:$0xff]  ;;  %v1162_v8 = vld [vmem:[#allocation7 + $0x90] sm:$0xff] }
  0x49   :  { %v1477_v7 = vpack.c.bf16 %v1145_v6, %v1144_v5  ;;  %v1163_v9 = vld [vmem:[#allocation7 + $0x98] sm:$0xff]  ;;  %v1146_v11 = vld [vmem:[#allocation7 + $0x10] sm:$0xff]  ;;  %v1164_v14 = vld [vmem:[#allocation7 + $0xa0] sm:$0xff] }
  0x4a   :  { %1476 = vmatprep.subr.bf16.mxu1 %v1475_v4  ;;  %v1479_v10 = vpack.c.bf16 %v1163_v9, %v1162_v8  ;;  %v1147_v12 = vld [vmem:[#allocation7 + $0x18] sm:$0xff]  ;;  %v1148_v16 = vld [vmem:[#allocation7 + $0x20] sm:$0xff]  ;;  %v1149_v17 = vld [vmem:[#allocation7 + $0x28] sm:$0xff] }
  0x4b   :  { %1462 = vmatpush1.bf16.msra.mxu0 %v1461_v32  ;;  %1478 = vmatpush3.bf16.msra.mxu1 %v1477_v7  ;;  %v1481_v13 = vpack.c.bf16 %v1147_v12, %v1146_v11  ;;  %v1485_v18 = vpack.c.bf16 %v1149_v17, %v1148_v16  ;;  %v1166_v19 = vld [vmem:[#allocation7 + $0xb0] sm:$0xff]  ;;  %v1167_v20 = vld [vmem:[#allocation7 + $0xb8] sm:$0xff]  ;;  %v1168_v25 = vld [vmem:[#allocation7 + $0xc0] sm:$0xff] }
  0x4c   :  { %1464 = vmatprep.subr.bf16.mxu0 %v1463_v33  ;;  %1480 = vmatprep.subr.bf16.mxu1 %v1479_v10  ;;  %v1487_v21 = vpack.c.bf16 %v1167_v20, %v1166_v19  ;;  %v1150_v22 = vld [vmem:[#allocation7 + $0x30] sm:$0xff]  ;;  %v1151_v23 = vld [vmem:[#allocation7 + $0x38] sm:$0xff]  ;;  %v1169_v26 = vld [vmem:[#allocation7 + $0xc8] sm:$0xff] }
  0x4d   :  { %v1489_v24 = vpack.c.bf16 %v1151_v23, %v1150_v22  ;;  %v1491_v27 = vpack.c.bf16 %v1169_v26, %v1168_v25  ;;  %v1152_v28 = vld [vmem:[#allocation7 + $0x40] sm:$0xff]  ;;  %v1153_v29 = vld [vmem:[#allocation7 + $0x48] sm:$0xff]  ;;  %v1170_v31 = vld [vmem:[#allocation7 + $0xd0] sm:$0xff] }
  0x4e   :  { %v1493_v30 = vpack.c.bf16 %v1153_v29, %v1152_v28  ;;  %v1171_v32 = vld [vmem:[#allocation7 + $0xd8] sm:$0xff]  ;;  %v1154_v34 = vld [vmem:[#allocation7 + $0x50] sm:$0xff]  ;;  %v1172_v37 = vld [vmem:[#allocation7 + $0xe0] sm:$0xff] }
  0x4f   :  { %1466 = vmatpush1.bf16.msra.mxu0 %v1465_v38  ;;  %1482 = vmatpush3.bf16.msra.mxu1 %v1481_v13  ;;  %v1495_v33 = vpack.c.bf16 %v1171_v32, %v1170_v31  ;;  %v1155_v35 = vld [vmem:[#allocation7 + $0x58] sm:$0xff]  ;;  %v1173_v38 = vld [vmem:[#allocation7 + $0xe8] sm:$0xff]  ;;  %v1156_v40 = vld [vmem:[#allocation7 + $0x60] sm:$0xff] }
  0x50   :  { %1468 = vmatprep.subr.bf16.mxu0 %v1467_v39  ;;  %v1497_v36 = vpack.c.bf16 %v1155_v35, %v1154_v34  ;;  %v1499_v39 = vpack.c.bf16 %v1173_v38, %v1172_v37  ;;  %v1157_v41 = vld [vmem:[#allocation7 + $0x68] sm:$0xff]  ;;  %v1174_v43 = vld [vmem:[#allocation7 + $0xf0] sm:$0xff]  ;;  %v1159_v47 = vld [vmem:[#allocation7 + $0x78] sm:$0xff] }
  0x51   :  { %v1501_v42 = vpack.c.bf16 %v1157_v41, %v1156_v40  ;;  %v1158_v46 = vld [vmem:[#allocation7 + $0x70] sm:$0xff] }
  0x53   :  { %1470 = vmatpush1.bf16.msra.mxu0 %v1469_v44  ;;  %v1175_v44 = vld [vmem:[#allocation7 + $0xf8] sm:$0xff] }
  0x54   :  { %1472 = vmatprep.subr.bf16.mxu0 %v1471_v45  ;;  %v1503_v45 = vpack.c.bf16 %v1175_v44, %v1174_v43 }
  0x57   :  { %1474 = vmatpush1.bf16.msra.mxu0 %v1473_v48  ;;  %v1505_v48 = vpack.c.bf16 %v1159_v47, %v1158_v46 }
  0x5a   :  { %184 = vmatmul.mubr.f32.vlgmr.msra.gmra.mrb[0].mxu0 %v59_v49  ;;  %v109_v49 = vlaneseq }
  0x5b   :  { %189 = vmatprep.mubr.f32.mxu0 %v1745_v0 }
  0x5e   :  { %190 = vmatmul.mubr.f32.gmra.mrb[2].mxu0 %v60_v50  ;;  %v110_v50 = vshrl.u32 %v109_v49, 7 }
  0x5f   :  { %195 = vmatprep.mubr.f32.mxu0 %v1745_v0 }
  0x62   :  { %196 = vmatmul.mubr.f32.gmra.mrb[4].mxu0 %v61_v51  ;;  %v111_v51 = vsub.s32 0, %v110_v50 }
  0x63   :  { %201 = vmatprep.mubr.f32.mxu0 %v1745_v0 }
  0x66   :  { %202 = vmatmul.mubr.f32.gmra.mrb[6].mxu0 %v62_v52  ;;  %v107_v52 = vld [vmem:[%s2631_s3] sm:$0x3] }
  0x67   :  { %207 = vmatprep.mubr.f32.mxu0 %v1745_v0 }
  0x6a   :  { %208 = vmatmul.mubr.f32.gmra.mrb[8].mxu0 %v63_v53  ;;  %v115_v53 = vsub.s32 1, %v110_v50 }
  0x6b   :  { %213 = vmatprep.mubr.f32.mxu0 %v1745_v0 }
  0x6e   :  { %214 = vmatmul.mubr.f32.gmra.mrb[10].mxu0 %v64_v54  ;;  %v1833_v54 = vrot.slane %v107_v52, %v111_v51 }
  0x6f   :  { %219 = vmatprep.mubr.f32.mxu0 %v1745_v0 }
  0x72   :  { %220 = vmatmul.mubr.f32.gmra.mrb[12].mxu0 %v65_v55 }
  0x73   :  { %225 = vmatprep.mubr.f32.mxu0 %v1745_v0 }
  0x76   :  { %226 = vmatmul.mubr.f32.gmra.mrb[14].mxu0 %v66_v56  ;;  %v1835_v56 = vrot.slane %v107_v52, %v115_v53 }
  0x77   :  { %231 = vmatprep.mubr.f32.mxu0 %v1745_v0 }
  0x7a   :  { %232 = vmatmul.mubr.f32.gmra.mrb[16].mxu0 %v67_v57 }
  0x7b   :  { %237 = vmatprep.mubr.f32.mxu0 %v1745_v0 }
  0x7e   :  { %238 = vmatmul.mubr.f32.gmra.mrb[18].mxu0 %v68_v58 }
  0x7f   :  { %243 = vmatprep.mubr.f32.mxu0 %v1745_v0 }
  0x82   :  { %244 = vmatmul.mubr.f32.gmra.mrb[20].mxu0 %v69_v59 }
  0x83   :  { %249 = vmatprep.mubr.f32.mxu0 %v1745_v0 }
  0x86   :  { %250 = vmatmul.mubr.f32.gmra.mrb[22].mxu0 %v70_v60 }
  0x87   :  { %255 = vmatprep.mubr.f32.mxu0 %v1745_v0 }
  0x8a   :  { %256 = vmatmul.mubr.f32.gmra.mrb[24].mxu0 %v71_v61 }
  0x8b   :  { %261 = vmatprep.mubr.f32.mxu0 %v1745_v0 }
  0x8e   :  { %262 = vmatmul.mubr.f32.gmra.mrb[26].mxu0 %v72_v62 }
  0x8f   :  { %267 = vmatprep.mubr.f32.mxu0 %v1745_v0 }
  0x92   :  { %268 = vmatmul.mubr.f32.gmra.mrb[28].mxu0 %v73_v63 }
  0x93   :  { %273 = vmatprep.mubr.f32.mxu0 %v1745_v0  ;;  %v1165_v0 = vld [vmem:[#allocation7 + $0xa8] sm:$0xff] }
  0x94   :  { %v1483_v15 = vpack.c.bf16 %v1165_v0, %v1164_v14 }
  0x96   :  { %274 = vmatmul.mubr.f32.gmra.mrb[30].mxu0 %v74_v1  ;;  %1484 = vmatprep.subr.bf16.mxu1 %v1483_v15 }
  0x97   :  { %1486 = vmatpush3.bf16.msra.mxu1 %v1485_v18 }
  0x98   :  { %1488 = vmatprep.subr.bf16.mxu1 %v1487_v21 }
  0x9b   :  { %1490 = vmatpush3.bf16.msra.mxu1 %v1489_v24 }
  0x9c   :  { %1492 = vmatprep.subr.bf16.mxu1 %v1491_v27 }
  0x9f   :  { %1494 = vmatpush3.bf16.msra.mxu1 %v1493_v30 }
  0xa0   :  { %1496 = vmatprep.subr.bf16.mxu1 %v1495_v33 }
  0xa3   :  { %1498 = vmatpush3.bf16.msra.mxu1 %v1497_v36 }
  0xa4   :  { %1500 = vmatprep.subr.bf16.mxu1 %v1499_v39 }
  0xa7   :  { %1502 = vmatpush3.bf16.msra.mxu1 %v1501_v42 }
  0xa8   :  { %1504 = vmatprep.subr.bf16.mxu1 %v1503_v45 }
  0xab   :  { %1506 = vmatpush3.bf16.msra.mxu1 %v1505_v48 }
 0x12d   :  { %v185_v55 = vpop.f32.mrb[0].mxu0 }
 0x12e   :  { %v187_v57 = vpop.f32.mrb[1].mxu0  ;;  %v186_v58 = vadd.f32 %v185_v55, %v1833_v54 }
 0x12f   :  { %v188_v59 = vadd.f32 %v187_v57, %v1835_v56 }
 0x130   :  { %v1840_v63 = vmul.f32 0.70710677, %v186_v58  ;;  %v1864_v32 = vmul.f32 0.5, %v186_v58 }
 0x131   :  { %v191_v60 = vpop.f32.mrb[2].mxu0  ;;  %v1842_v1 = vmul.f32 0.70710677, %v188_v59  ;;  %v1867_v39 = vmul.f32 0.5, %v188_v59 }
 0x132   :  { %v193_v61 = vpop.f32.mrb[3].mxu0  ;;  %v192_v62 = vadd.f32 %v191_v60, %v1833_v54  ;;  %v344_v6 = vand.u32 2147483647, %v1840_v63  ;;  %vm984_vm1 = vcmp.ge.f32.partialorder %v1840_v63, 0.0 }
 0x133   :  { %v194_v4 = vadd.f32 %v193_v61, %v1835_v56  ;;  %v345_v7 = vand.u32 2147483647, %v1842_v1  ;;  %vm985_vm0 = vcmp.ge.f32.partialorder %v1842_v1, 0.0 }
 0x134   :  { %v1844_v3 = vmul.f32 0.70710677, %v192_v62  ;;  %v376_v13 = vmul.f32 0.3275911, %v344_v6  ;;  %v792_v14 = vsub.f32 0.0, %v344_v6  ;;  %v1869_v41 = vmul.f32 0.5, %v192_v62 }
 0x135   :  { %v197_v2 = vpop.f32.mrb[4].mxu0  ;;  %v1851_v12 = vmul.f32 0.70710677, %v194_v4  ;;  %v377_v15 = vmul.f32 0.3275911, %v345_v7  ;;  %v793_v16 = vsub.f32 0.0, %v345_v7 }
 0x136   :  { %v199_v5 = vpop.f32.mrb[5].mxu0  ;;  %v198_v9 = vadd.f32 %v197_v2, %v1833_v54  ;;  %v346_v11 = vand.u32 2147483647, %v1844_v3  ;;  %v408_v22 = vadd.f32 1.0, %v376_v13  ;;  %v824_v23 = vmul.f32 %v792_v14, %v344_v6  ;;  %2690 = vst [vmem:[#allocation13_spill] sm:$0xff] %v1869_v41 }
 0x137   :  { %v200_v0 = vadd.f32 %v199_v5, %v1835_v56  ;;  %v347_v21 = vand.u32 2147483647, %v1851_v12  ;;  %v409_v25 = vadd.f32 1.0, %v377_v15  ;;  %v825_v26 = vmul.f32 %v793_v16, %v345_v7 }
 0x138   :  { %v1854_v18 = vmul.f32 0.70710677, %v198_v9  ;;  %v794_v20 = vsub.f32 0.0, %v346_v11  ;;  %v378_v28 = vmul.f32 0.3275911, %v346_v11  ;;  %1516 = vrcp.f32 %v408_v22 }
 0x139   :  { %v203_v8 = vpop.f32.mrb[6].mxu0  ;;  %v1857_v24 = vmul.f32 0.70710677, %v200_v0  ;;  %v379_v34 = vmul.f32 0.3275911, %v347_v21  ;;  %v795_v35 = vsub.f32 0.0, %v347_v21  ;;  %1518 = vrcp.f32 %v409_v25 }
 0x13a   :  { %v205_v10 = vpop.f32.mrb[7].mxu0  ;;  %2689 = vst [vmem:[#allocation12_spill] sm:$0xff] %v1854_v18  ;;  %v204_v27 = vadd.f32 %v203_v8, %v1833_v54  ;;  %v348_v29 = vand.u32 2147483647, %v1854_v18  ;;  %v826_v33 = vmul.f32 %v794_v20, %v346_v11  ;;  %v856_v37 = vmul.f32 1.442695, %v824_v23 }
 0x13b   :  { %v1862_v30 = vadd.f32 %v205_v10, %v1835_v56  ;;  %v349_v38 = vand.u32 2147483647, %v1857_v24  ;;  %v858_v40 = vmul.f32 1.442695, %v825_v26  ;;  %v410_v44 = vadd.f32 1.0, %v378_v28 }
 0x13c   :  { %v1871_v42 = vmul.f32 0.70710677, %v204_v27  ;;  %v796_v45 = vsub.f32 0.0, %v348_v29  ;;  %v860_v49 = vmul.f32 1.442695, %v826_v33  ;;  %v411_v50 = vadd.f32 1.0, %v379_v34 }
 0x13d   :  { %v209_v17 = vpop.f32.mrb[8].mxu0  ;;  %v1874_v46 = vmul.f32 0.70710677, %v1862_v30  ;;  %v827_v51 = vmul.f32 %v795_v35, %v347_v21  ;;  %1520 = vpow2.f32 %v856_v37  ;;  %v380_v53 = vmul.f32 0.3275911, %v348_v29 }
 0x13e   :  { %v211_v19 = vpop.f32.mrb[9].mxu0  ;;  %2691 = vst [vmem:[#allocation14_spill] sm:$0xff] %v1871_v42  ;;  %v1877_v47 = vadd.f32 %v209_v17, %v1833_v54  ;;  %v381_v55 = vmul.f32 0.3275911, %v349_v38  ;;  %v797_v57 = vsub.f32 0.0, %v349_v38  ;;  %1522 = vpow2.f32 %v858_v40 }
 0x13f   :  { %2692 = vst [vmem:[#allocation15_spill] sm:$0xff] %v1874_v46  ;;  %v1880_v52 = vadd.f32 %v211_v19, %v1835_v56  ;;  %v1882_v58 = vmul.f32 0.5, %v194_v4  ;;  %v350_v59 = vand.u32 2147483647, %v1871_v42  ;;  %1524 = vrcp.f32 %v410_v44 }
 0x140   :  { %v1886_v60 = vmul.f32 0.70710677, %v1877_v47  ;;  %v828_v62 = vmul.f32 %v796_v45, %v348_v29  ;;  %v351_v2 = vand.u32 2147483647, %v1874_v46  ;;  %1526 = vrcp.f32 %v411_v50 }
 0x141   :  { %v215_v31 = vpop.f32.mrb[10].mxu0  ;;  %v1892_v5 = vmul.f32 0.70710677, %v1880_v52  ;;  %v862_v7 = vmul.f32 1.442695, %v827_v51  ;;  %v1896_v4 = vmul.f32 0.5, %v198_v9  ;;  %v829_v13 = vmul.f32 %v797_v57, %v349_v38 }
 0x142   :  { %v217_v36 = vpop.f32.mrb[11].mxu0  ;;  %2693 = vst [vmem:[#allocation16_spill] sm:$0xff] %v1886_v60  ;;  %v1899_v8 = vadd.f32 %v215_v31, %v1833_v54  ;;  %v412_v10 = vadd.f32 1.0, %v380_v53  ;;  %v1901_v11 = vmul.f32 0.5, %v200_v0  ;;  %v413_v15 = vadd.f32 1.0, %v381_v55  ;;  %v1907_v20 = vpop.eup %1516 }
 0x143   :  { %2694 = vst [vmem:[#allocation17_spill] sm:$0xff] %v1892_v5  ;;  %2695 = vst [vmem:[#allocation18_spill] sm:$0xff] %v1896_v4  ;;  %v1904_v14 = vadd.f32 %v217_v36, %v1835_v56  ;;  %v382_v16 = vmul.f32 0.3275911, %v350_v59  ;;  %v798_v17 = vsub.f32 0.0, %v350_v59  ;;  %1528 = vpow2.f32 %v860_v49  ;;  %v1912_v0 = vpop.eup %1518 }
 0x144   :  { %2696 = vst [vmem:[#allocation19_spill] sm:$0xff] %v1901_v11  ;;  %v352_v19 = vand.u32 2147483647, %v1886_v60  ;;  %v864_v9 = vmul.f32 1.442695, %v828_v62  ;;  %v799_v21 = vsub.f32 0.0, %v351_v2  ;;  %1530 = vpow2.f32 %v862_v7 }
 0x145   :  { %v221_v43 = vpop.f32.mrb[12].mxu0  ;;  %v353_v22 = vand.u32 2147483647, %v1892_v5  ;;  %v1914_v25 = vmul.f32 0.5, %v204_v27  ;;  %v383_v26 = vmul.f32 0.3275911, %v351_v2  ;;  %1532 = vrcp.f32 %v412_v10 }
 0x146   :  { %v223_v48 = vpop.f32.mrb[13].mxu0  ;;  %v1917_v28 = vmul.f32 0.70710677, %v1899_v8  ;;  %v866_v31 = vmul.f32 1.442695, %v829_v13  ;;  %v1922_v33 = vmul.f32 0.5, %v1862_v30  ;;  %1534 = vrcp.f32 %v413_v15 }
 0x147   :  { %2697 = vst [vmem:[#allocation20_spill] sm:$0xff] %v1914_v25  ;;  %v1925_v34 = vmul.f32 0.70710677, %v1904_v14  ;;  %v414_v35 = vadd.f32 1.0, %v382_v16  ;;  %v830_v36 = vmul.f32 %v798_v17, %v350_v59  ;;  %v800_v37 = vsub.f32 0.0, %v352_v19  ;;  %v1929_v38 = vpop.eup %1520 }
 0x148   :  { %2698 = vst [vmem:[#allocation21_spill] sm:$0xff] %v1917_v28  ;;  %2699 = vst [vmem:[#allocation22_spill] sm:$0xff] %v1922_v33  ;;  %1536 = vpow2.f32 %v864_v9  ;;  %v831_v40 = vmul.f32 %v799_v21, %v351_v2  ;;  %v801_v44 = vsub.f32 0.0, %v353_v22  ;;  %v1932_v45 = vadd.f32 %v221_v43, %v1833_v54  ;;  %v1936_v30 = vpop.eup %1522 }
 0x149   :  { %v1888_v61 = vpop.f32.mrb[14].mxu0  ;;  %2700 = vst [vmem:[#allocation23_spill] sm:$0xff] %v1925_v34  ;;  %v415_v50 = vadd.f32 1.0, %v383_v26  ;;  %v384_v51 = vmul.f32 0.3275911, %v352_v19  ;;  %v1940_v55 = vadd.f32 %v223_v48, %v1835_v56  ;;  %v1942_v57 = vpop.eup %1524  ;;  %1538 = vpow2.f32 %v866_v31 }
 0x14a   :  { %v1894_v6 = vpop.f32.mrb[15].mxu0  ;;  %v354_v53 = vand.u32 2147483647, %v1917_v28  ;;  %v385_v59 = vmul.f32 0.3275911, %v353_v22  ;;  %v1948_v2 = vpop.eup %1526  ;;  %1540 = vrcp.f32 %v414_v35  ;;  %v832_v10 = vmul.f32 %v800_v37, %v352_v19 }
 0x14b   :  { %v355_v62 = vand.u32 2147483647, %v1925_v34  ;;  %v1946_v43 = vmul.f32 0.70710677, %v1932_v45  ;;  %v868_v7 = vmul.f32 1.442695, %v830_v36  ;;  %v833_v17 = vmul.f32 %v801_v44, %v353_v22 }
 0x14c   :  { %v1951_v13 = vmul.f32 0.70710677, %v1940_v55  ;;  %v870_v48 = vmul.f32 1.442695, %v831_v40  ;;  %v1956_v16 = vmul.f32 0.5, %v1877_v47  ;;  %v1960_v9 = vadd.f32 %v1888_v61, %v1833_v54 }
 0x14d   :  { %v1910_v23 = vpop.f32.mrb[16].mxu0  ;;  %2701 = vst [vmem:[#allocation24_spill] sm:$0xff] %v1946_v43  ;;  %v416_v26 = vadd.f32 1.0, %v384_v51  ;;  %v386_v31 = vmul.f32 0.3275911, %v354_v53  ;;  %v1967_v35 = vadd.f32 %v1894_v6, %v1835_v56  ;;  %v1969_v36 = vpop.eup %1528  ;;  %1542 = vrcp.f32 %v415_v50 }
 0x14e   :  { %v1919_v29 = vpop.f32.mrb[17].mxu0  ;;  %2702 = vst [vmem:[#allocation25_spill] sm:$0xff] %v1951_v13  ;;  %2703 = vst [vmem:[#allocation26_spill] sm:$0xff] %v1956_v16  ;;  %v356_v19 = vand.u32 2147483647, %v1946_v43  ;;  %v417_v47 = vadd.f32 1.0, %v385_v59  ;;  %v1971_v40 = vpop.eup %1530  ;;  %1544 = vpow2.f32 %v868_v7 }
 0x14f   :  { %v802_v37 = vsub.f32 0.0, %v354_v53  ;;  %v387_v22 = vmul.f32 0.3275911, %v355_v62  ;;  %v872_v61 = vmul.f32 1.442695, %v832_v10  ;;  %v803_v44 = vsub.f32 0.0, %v355_v62  ;;  %v1974_v16 = vpop.eup %1532 }
 0x150   :  { %v357_v51 = vand.u32 2147483647, %v1951_v13  ;;  %1546 = vpow2.f32 %v870_v48  ;;  %v1977_v43 = vmul.f32 0.5, %v1880_v52  ;;  %v874_v6 = vmul.f32 1.442695, %v833_v17  ;;  %v1984_v59 = vpop.eup %1534 }
 0x151   :  { %v1927_v27 = vpop.f32.mrb[18].mxu0  ;;  %v1980_v25 = vmul.f32 0.70710677, %v1960_v9  ;;  %1548 = vrcp.f32 %v416_v26  ;;  %v418_v7 = vadd.f32 1.0, %v386_v31  ;;  %v804_v10 = vsub.f32 0.0, %v356_v19 }
 0x152   :  { %v1934_v49 = vpop.f32.mrb[19].mxu0  ;;  %2704 = vst [vmem:[#allocation27_spill] sm:$0xff] %v1977_v43  ;;  %v1987_v33 = vmul.f32 0.70710677, %v1967_v35  ;;  %v1991_v48 = vpop.eup %1536  ;;  %1550 = vrcp.f32 %v417_v47  ;;  %v1994_v52 = vmul.f32 0.5, %v1899_v8  ;;  %v834_v17 = vmul.f32 %v802_v37, %v354_v53 }
 0x153   :  { %2705 = vst [vmem:[#allocation28_spill] sm:$0xff] %v1980_v25  ;;  %2707 = vst [vmem:[#allocation30_spill] sm:$0xff] %v1991_v48  ;;  %v419_v43 = vadd.f32 1.0, %v387_v22  ;;  %1552 = vpow2.f32 %v872_v61  ;;  %v835_v28 = vmul.f32 %v803_v44, %v355_v62  ;;  %v388_v4 = vmul.f32 0.3275911, %v356_v19  ;;  %v1998_v31 = vpop.eup %1538 }
 0x154   :  { %2706 = vst [vmem:[#allocation29_spill] sm:$0xff] %v1987_v33  ;;  %2708 = vst [vmem:[#allocation31_spill] sm:$0xff] %v1994_v52  ;;  %v805_v34 = vsub.f32 0.0, %v357_v51  ;;  %1554 = vpow2.f32 %v874_v6  ;;  %v389_v60 = vmul.f32 0.3275911, %v357_v51  ;;  %v2003_v47 = vadd.f32 %v1910_v23, %v1833_v54  ;;  %v2007_v53 = vpop.eup %1540 }
 0x155   :  { %v1953_v15 = vpop.f32.mrb[20].mxu0  ;;  %2709 = vst [vmem:[#allocation32_spill] sm:$0xff] %v1998_v31  ;;  %v358_v5 = vand.u32 2147483647, %v1980_v25  ;;  %1556 = vrcp.f32 %v418_v7  ;;  %v836_v62 = vmul.f32 %v804_v10, %v356_v19  ;;  %v359_v37 = vand.u32 2147483647, %v1987_v33 }
 0x156   :  { %v1962_v21 = vpop.f32.mrb[21].mxu0  ;;  %v2012_v22 = vadd.f32 %v1919_v29, %v1835_v56  ;;  %v876_v61 = vmul.f32 1.442695, %v834_v17  ;;  %v2015_v44 = vmul.f32 0.5, %v1904_v14  ;;  %1558 = vrcp.f32 %v419_v43 }
 0x157   :  { %v2018_v23 = vmul.f32 0.70710677, %v2003_v47  ;;  %v878_v6 = vmul.f32 1.442695, %v835_v28  ;;  %v420_v25 = vadd.f32 1.0, %v388_v4  ;;  %v837_v52 = vmul.f32 %v805_v34, %v357_v51  ;;  %v2025_v10 = vpop.eup %1542 }
 0x158   :  { %2710 = vst [vmem:[#allocation33_spill] sm:$0xff] %v2015_v44  ;;  %v2021_v7 = vmul.f32 0.70710677, %v2012_v22  ;;  %v421_v29 = vadd.f32 1.0, %v389_v60  ;;  %v390_v33 = vmul.f32 0.3275911, %v358_v5  ;;  %v2029_v14 = vadd.f32 %v1927_v27, %v1833_v54  ;;  %v2033_v44 = vpop.eup %1544 }
 0x159   :  { %v1982_v50 = vpop.f32.mrb[22].mxu0  ;;  %2711 = vst [vmem:[#allocation34_spill] sm:$0xff] %v2018_v23  ;;  %v806_v17 = vsub.f32 0.0, %v358_v5  ;;  %2713 = vst [vmem:[#allocation36_spill] sm:$0xff] %v2033_v44  ;;  %v880_v4 = vmul.f32 1.442695, %v836_v62  ;;  %v2038_v51 = vadd.f32 %v1934_v49, %v1835_v56  ;;  %1560 = vpow2.f32 %v876_v61 }
 0x15a   :  { %v1989_v13 = vpop.f32.mrb[23].mxu0  ;;  %2712 = vst [vmem:[#allocation35_spill] sm:$0xff] %v2021_v7  ;;  %v391_v28 = vmul.f32 0.3275911, %v359_v37  ;;  %v360_v34 = vand.u32 2147483647, %v2018_v23  ;;  %v2040_v11 = vpop.eup %1546  ;;  %1562 = vpow2.f32 %v878_v6 }
 0x15b   :  { %2714 = vst [vmem:[#allocation37_spill] sm:$0xff] %v2040_v11  ;;  %v807_v60 = vsub.f32 0.0, %v359_v37  ;;  %v361_v46 = vand.u32 2147483647, %v2021_v7  ;;  %v2044_v27 = vmul.f32 0.70710677, %v2029_v14  ;;  %v2046_v42 = vpop.eup %1548  ;;  %1564 = vrcp.f32 %v420_v25 }
 0x15c   :  { %v2049_v62 = vmul.f32 0.5, %v1932_v45  ;;  %v882_v23 = vmul.f32 1.442695, %v837_v52  ;;  %v2052_v44 = vmul.f32 0.70710677, %v2038_v51  ;;  %v2054_v49 = vpop.eup %1550  ;;  %v2057_v61 = vmul.f32 0.5, %v1940_v55 }
 0x15d   :  { %v1996_v26 = vpop.f32.mrb[24].mxu0  ;;  %2715 = vst [vmem:[#allocation38_spill] sm:$0xff] %v2044_v27  ;;  %v422_v7 = vadd.f32 1.0, %v390_v33  ;;  %v838_v11 = vmul.f32 %v806_v17, %v358_v5  ;;  %v2061_v18 = vpop.eup %1552  ;;  %1566 = vrcp.f32 %v421_v29  ;;  %v2064_v45 = vmul.f32 0.5, %v1960_v9 }
 0x15e   :  { %v2005_v8 = vpop.f32.mrb[25].mxu0  ;;  %2716 = vst [vmem:[#allocation39_spill] sm:$0xff] %v2049_v62  ;;  %2717 = vst [vmem:[#allocation40_spill] sm:$0xff] %v2052_v44  ;;  %v423_v52 = vadd.f32 1.0, %v391_v28  ;;  %v808_v6 = vsub.f32 0.0, %v360_v34  ;;  %v2068_v31 = vpop.eup %1554  ;;  %1568 = vpow2.f32 %v880_v4  ;;  %v839_v25 = vmul.f32 %v807_v60, %v359_v37 }
 0x15f   :  { %2718 = vst [vmem:[#allocation41_spill] sm:$0xff] %v2057_v61  ;;  %2719 = vst [vmem:[#allocation42_spill] sm:$0xff] %v2061_v18  ;;  %v809_v55 = vsub.f32 0.0, %v361_v46  ;;  %v362_v33 = vand.u32 2147483647, %v2044_v27  ;;  %v2071_v5 = vpop.eup %1556  ;;  %1570 = vpow2.f32 %v882_v23  ;;  %v2074_v17 = vmul.f32 0.5, %v1967_v35 }
 0x160   :  { %2720 = vst [vmem:[#allocation43_spill] sm:$0xff] %v2064_v45  ;;  %2721 = vst [vmem:[#allocation44_spill] sm:$0xff] %v2068_v31  ;;  %v392_v29 = vmul.f32 0.3275911, %v360_v34  ;;  %v363_v9 = vand.u32 2147483647, %v2052_v44  ;;  %v2079_v45 = vpop.eup %1558  ;;  %1572 = vrcp.f32 %v422_v7  ;;  %v246_v37 = vadd.f32 %v1953_v15, %v1833_v54 }
 0x161   :  { %v2023_v19 = vpop.f32.mrb[26].mxu0  ;;  %2722 = vst [vmem:[#allocation45_spill] sm:$0xff] %v2071_v5  ;;  %2723 = vst [vmem:[#allocation46_spill] sm:$0xff] %v2074_v17  ;;  %v884_v61 = vmul.f32 1.442695, %v838_v11  ;;  %1574 = vrcp.f32 %v423_v52  ;;  %v2086_v23 = vmul.f32 0.5, %v2003_v47  ;;  %v840_v35 = vmul.f32 %v808_v6, %v360_v34 }
 0x162   :  { %v2031_v43 = vpop.f32.mrb[27].mxu0  ;;  %2724 = vst [vmem:[#allocation47_spill] sm:$0xff] %v2079_v45  ;;  %v393_v4 = vmul.f32 0.3275911, %v361_v46  ;;  %v248_v27 = vadd.f32 %v1962_v21, %v1835_v56  ;;  %v886_v17 = vmul.f32 1.442695, %v839_v25  ;;  %v841_v44 = vmul.f32 %v809_v55, %v361_v46 }
 0x163   :  { %2725 = vst [vmem:[#allocation48_spill] sm:$0xff] %v2086_v23  ;;  %v810_v18 = vsub.f32 0.0, %v362_v33  ;;  %v2090_v31 = vmul.f32 0.70710677, %v246_v37  ;;  %v424_v11 = vadd.f32 1.0, %v392_v29  ;;  %v811_v5 = vsub.f32 0.0, %v363_v9  ;;  %v2094_v15 = vpop.eup %1560 }
 0x164   :  { %v394_v7 = vmul.f32 0.3275911, %v362_v33  ;;  %v2092_v45 = vmul.f32 0.70710677, %v248_v27  ;;  %2728 = vst [vmem:[#allocation51_spill] sm:$0xff] %v2094_v15  ;;  %v425_v52 = vadd.f32 1.0, %v393_v4  ;;  %v252_v34 = vadd.f32 %v1982_v50, %v1833_v54  ;;  %v2099_v21 = vpop.eup %1562 }
 0x165   :  { %v2059_v48 = vpop.f32.mrb[28].mxu0  ;;  %2726 = vst [vmem:[#allocation49_spill] sm:$0xff] %v2090_v31  ;;  %v395_v41 = vmul.f32 0.3275911, %v363_v9  ;;  %v364_v47 = vand.u32 2147483647, %v2090_v31  ;;  %1576 = vpow2.f32 %v884_v61  ;;  %v2104_v25 = vadd.f32 %v1989_v13, %v1835_v56  ;;  %v2106_v55 = vpop.eup %1564 }
 0x166   :  { %v2066_v62 = vpop.f32.mrb[29].mxu0  ;;  %2727 = vst [vmem:[#allocation50_spill] sm:$0xff] %v2092_v45  ;;  %2729 = vst [vmem:[#allocation52_spill] sm:$0xff] %v2099_v21  ;;  %v888_v46 = vmul.f32 1.442695, %v840_v35  ;;  %1578 = vpow2.f32 %v886_v17  ;;  %v842_v4 = vmul.f32 %v810_v18, %v362_v33  ;;  %v426_v50 = vadd.f32 1.0, %v394_v7 }
 0x167   :  { %v365_v6 = vand.u32 2147483647, %v2092_v45  ;;  %v890_v29 = vmul.f32 1.442695, %v841_v44  ;;  %v2108_v23 = vmul.f32 0.70710677, %v252_v34  ;;  %v2110_v31 = vpop.eup %1566  ;;  %1580 = vrcp.f32 %v424_v11 }
 0x168   :  { %v843_v15 = vmul.f32 %v811_v5, %v363_v9  ;;  %v812_v61 = vsub.f32 0.0, %v364_v47  ;;  %v2112_v35 = vpop.eup %1568  ;;  %v2115_v45 = vmul.f32 0.5, %v2012_v22  ;;  %1582 = vrcp.f32 %v425_v52 }
 0x169   :  { %v2077_v28 = vpop.f32.mrb[30].mxu0  ;;  %2730 = vst [vmem:[#allocation53_spill] sm:$0xff] %v2108_v23  ;;  %v427_v13 = vadd.f32 1.0, %v395_v41  ;;  %v2118_v21 = vmul.f32 0.70710677, %v2104_v25  ;;  %v2120_v44 = vpop.eup %1570  ;;  %1584 = vpow2.f32 %v888_v46  ;;  %v2123_v18 = vmul.f32 0.5, %v2029_v14 }
 0x16a   :  { %v2083_v60 = vpop.f32.mrb[31].mxu0  ;;  %2731 = vst [vmem:[#allocation54_spill] sm:$0xff] %v2115_v45  ;;  %v396_v33 = vmul.f32 0.3275911, %v364_v47  ;;  %v813_v17 = vsub.f32 0.0, %v365_v6  ;;  %v2125_v5 = vpop.eup %1572  ;;  %1586 = vpow2.f32 %v890_v29  ;;  %v2128_v22 = vmul.f32 0.5, %v2038_v51 }
 0x16b   :  { %2732 = vst [vmem:[#allocation55_spill] sm:$0xff] %v2118_v21  ;;  %2733 = vst [vmem:[#allocation56_spill] sm:$0xff] %v2123_v18  ;;  %v892_v9 = vmul.f32 1.442695, %v842_v4  ;;  %v366_v41 = vand.u32 2147483647, %v2108_v23  ;;  %v2131_v11 = vpop.eup %1574  ;;  %1588 = vrcp.f32 %v426_v50  ;;  %v844_v52 = vmul.f32 %v812_v61, %v364_v47 }
 0x16c   :  { %2734 = vst [vmem:[#allocation57_spill] sm:$0xff] %v2128_v22  ;;  %v894_v7 = vmul.f32 1.442695, %v843_v15  ;;  %v397_v46 = vmul.f32 0.3275911, %v365_v6  ;;  %1590 = vrcp.f32 %v427_v13  ;;  %v2133_v14 = vmul.f32 0.5, %v246_v37 }
 0x16d   :  { %v367_v18 = vand.u32 2147483647, %v2118_v21  ;;  %v258_v29 = vadd.f32 %v1996_v26, %v1833_v54  ;;  %v428_v4 = vadd.f32 1.0, %v396_v33  ;;  %v2138_v45 = vmul.f32 0.5, %v248_v27 }
 0x16e   :  { %2735 = vst [vmem:[#allocation58_spill] sm:$0xff] %v2133_v14  ;;  %v845_v51 = vmul.f32 %v813_v17, %v365_v6  ;;  %v260_v23 = vadd.f32 %v2005_v8, %v1835_v56  ;;  %1592 = vpow2.f32 %v892_v9  ;;  %v398_v50 = vmul.f32 0.3275911, %v366_v41 }
 0x16f   :  { %2736 = vst [vmem:[#allocation59_spill] sm:$0xff] %v2138_v45  ;;  %v814_v15 = vsub.f32 0.0, %v366_v41  ;;  %v2142_v47 = vmul.f32 0.70710677, %v258_v29  ;;  %v2144_v61 = vpop.eup %1576  ;;  %1594 = vpow2.f32 %v894_v7  ;;  %v896_v37 = vmul.f32 1.442695, %v844_v52 }
 0x170   :  { %2738 = vst [vmem:[#allocation61_spill] sm:$0xff] %v2144_v61  ;;  %v429_v13 = vadd.f32 1.0, %v397_v46  ;;  %v2146_v14 = vmul.f32 0.70710677, %v260_v23  ;;  %v2148_v26 = vpop.eup %1578  ;;  %v399_v27 = vmul.f32 0.3275911, %v367_v18  ;;  %v2153_v8 = vadd.f32 %v2023_v19, %v1833_v54 }
 0x171   :  { %2737 = vst [vmem:[#allocation60_spill] sm:$0xff] %v2142_v47  ;;  %2740 = vst [vmem:[#allocation63_spill] sm:$0xff] %v2148_v26  ;;  %v815_v33 = vsub.f32 0.0, %v367_v18  ;;  %v368_v6 = vand.u32 2147483647, %v2142_v47  ;;  %v2155_v17 = vpop.eup %1580  ;;  %1596 = vrcp.f32 %v428_v4  ;;  %v2157_v45 = vmul.f32 0.5, %v252_v34 }
 0x172   :  { %2739 = vst [vmem:[#allocation62_spill] sm:$0xff] %v2146_v14  ;;  %2741 = vst [vmem:[#allocation64_spill] sm:$0xff] %v2153_v8  ;;  %v898_v9 = vmul.f32 1.442695, %v845_v51  ;;  %v505_v7 = vmul.f32 1.0614054, %v1912_v0  ;;  %v2160_v52 = vpop.eup %1582  ;;  %v846_v21 = vmul.f32 %v814_v15, %v366_v41  ;;  %1598 = vrcp.f32 %v429_v13 }
 0x173   :  { %2742 = vst [vmem:[#allocation65_spill] sm:$0xff] %v2157_v45  ;;  %v430_v46 = vadd.f32 1.0, %v398_v50  ;;  %v369_v22 = vand.u32 2147483647, %v2146_v14  ;;  %v2164_v47 = vmul.f32 0.70710677, %v2153_v8  ;;  %v2166_v61 = vpop.eup %1584  ;;  %v2170_v34 = vadd.f32 %v2031_v43, %v1835_v56 }
 0x174   :  { %2744 = vst [vmem:[#allocation67_spill] sm:$0xff] %v2166_v61  ;;  %v816_v19 = vsub.f32 0.0, %v368_v6  ;;  %v537_v26 = vadd.f32 -1.4531521, %v505_v7  ;;  %v2172_v4 = vpop.eup %1586  ;;  %1600 = vpow2.f32 %v896_v37  ;;  %v431_v51 = vadd.f32 1.0, %v399_v27 }
 0x175   :  { %2743 = vst [vmem:[#allocation66_spill] sm:$0xff] %v2164_v47  ;;  %2745 = vst [vmem:[#allocation68_spill] sm:$0xff] %v2172_v4  ;;  %v847_v50 = vmul.f32 %v815_v33, %v367_v18  ;;  %v370_v41 = vand.u32 2147483647, %v2164_v47  ;;  %v2175_v15 = vpop.eup %1588  ;;  %1602 = vpow2.f32 %v898_v9  ;;  %v2178_v8 = vmul.f32 0.5, %v2104_v25 }
 0x176   :  { %v400_v13 = vmul.f32 0.3275911, %v368_v6  ;;  %v569_v7 = vmul.f32 %v1912_v0, %v537_v26  ;;  %v2181_v45 = vpop.eup %1590  ;;  %1604 = vrcp.f32 %v430_v46  ;;  %v900_v43 = vmul.f32 1.442695, %v846_v21 }
 0x177   :  { %2746 = vst [vmem:[#allocation69_spill] sm:$0xff] %v2178_v8  ;;  %v401_v14 = vmul.f32 0.3275911, %v369_v22  ;;  %v817_v61 = vsub.f32 0.0, %v369_v22  ;;  %v2183_v37 = vmul.f32 0.5, %v258_v29  ;;  %v848_v18 = vmul.f32 %v816_v19, %v368_v6 }
 0x178   :  { %v601_v27 = vadd.f32 1.4214138, %v569_v7  ;;  %v2186_v33 = vmul.f32 0.70710677, %v2170_v34  ;;  %v2188_v9 = vpop.eup %1592  ;;  %1606 = vrcp.f32 %v431_v51  ;;  %v902_v25 = vmul.f32 1.442695, %v847_v50 }
 0x179   :  { %2747 = vst [vmem:[#allocation70_spill] sm:$0xff] %v2183_v37  ;;  %2749 = vst [vmem:[#allocation72_spill] sm:$0xff] %v2188_v9  ;;  %v818_v47 = vsub.f32 0.0, %v370_v41  ;;  %v504_v26 = vmul.f32 1.0614054, %v1907_v20  ;;  %v2191_v8 = vpop.eup %1594  ;;  %v432_v46 = vadd.f32 1.0, %v400_v13  ;;  %v849_v7 = vmul.f32 %v817_v61, %v369_v22 }
 0x17a   :  { %2748 = vst [vmem:[#allocation71_spill] sm:$0xff] %v2186_v33  ;;  %2750 = vst [vmem:[#allocation73_spill] sm:$0xff] %v2191_v8  ;;  %v2193_v21 = vmul.f32 0.5, %v260_v23  ;;  %v633_v29 = vmul.f32 %v1912_v0, %v601_v27  ;;  %v371_v6 = vand.u32 2147483647, %v2186_v33  ;;  %v433_v19 = vadd.f32 1.0, %v401_v14 }
 0x17b   :  { %v536_v37 = vadd.f32 -1.4531521, %v504_v26  ;;  %v2199_v9 = vadd.f32 %v2059_v48, %v1833_v54  ;;  %v2201_v51 = vpop.eup %1596  ;;  %1608 = vpow2.f32 %v900_v43  ;;  %v904_v50 = vmul.f32 1.442695, %v848_v18 }
 0x17c   :  { %2751 = vst [vmem:[#allocation74_spill] sm:$0xff] %v2193_v21  ;;  %v402_v4 = vmul.f32 0.3275911, %v370_v41  ;;  %v665_v8 = vadd.f32 -0.28449672, %v633_v29  ;;  %1610 = vpow2.f32 %v902_v25  ;;  %v850_v23 = vmul.f32 %v818_v47, %v370_v41  ;;  %v2208_v22 = vpop.eup %1598 }
 0x17d   :  { %2752 = vst [vmem:[#allocation75_spill] sm:$0xff] %v2199_v9  ;;  %v568_v13 = vmul.f32 %v1907_v20, %v536_v37  ;;  %v2206_v27 = vadd.f32 %v2066_v62, %v1835_v56  ;;  %1612 = vrcp.f32 %v432_v46  ;;  %v819_v14 = vsub.f32 0.0, %v371_v6 }
 0x17e   :  { %v697_v48 = vmul.f32 %v1912_v0, %v665_v8  ;;  %v507_v61 = vmul.f32 1.0614054, %v1948_v2  ;;  %v2212_v43 = vpop.eup %1600  ;;  %1614 = vrcp.f32 %v433_v19  ;;  %v906_v18 = vmul.f32 1.442695, %v849_v7 }
 0x17f   :  { %2753 = vst [vmem:[#allocation76_spill] sm:$0xff] %v2206_v27  ;;  %2754 = vst [vmem:[#allocation77_spill] sm:$0xff] %v2212_v43  ;;  %v600_v25 = vadd.f32 1.4214138, %v568_v13  ;;  %v2215_v47 = vmul.f32 0.70710677, %v2199_v9  ;;  %v2217_v41 = vpop.eup %1602  ;;  %1616 = vpow2.f32 %v904_v50  ;;  %v851_v13 = vmul.f32 %v819_v14, %v371_v6 }
 0x180   :  { %v434_v62 = vadd.f32 1.0, %v402_v4  ;;  %v729_v37 = vadd.f32 0.2548296, %v697_v48  ;;  %v539_v26 = vadd.f32 -1.4531521, %v507_v61  ;;  %v2219_v46 = vpop.eup %1604  ;;  %1618 = vpow2.f32 %v906_v18 }
 0x181   :  { %2755 = vst [vmem:[#allocation78_spill] sm:$0xff] %v2215_v47  ;;  %v908_v8 = vmul.f32 1.442695, %v850_v23  ;;  %v403_v29 = vmul.f32 0.3275911, %v371_v6  ;;  %v632_v21 = vmul.f32 %v1907_v20, %v600_v25  ;;  %vm987_vm2 = vcmp.ge.f32.partialorder %v1851_v12, 0.0 }
 0x182   :  { %v2224_v19 = vmul.f32 0.70710677, %v2206_v27  ;;  %v761_v7 = vmul.f32 %v1912_v0, %v729_v37  ;;  %v571_v9 = vmul.f32 %v1948_v2, %v539_v26  ;;  %v506_v4 = vmul.f32 1.0614054, %v1942_v57  ;;  %v2229_v50 = vpop.eup %1606 }
 0x183   :  { %v664_v48 = vadd.f32 -0.28449672, %v632_v21  ;;  %v372_v23 = vand.u32 2147483647, %v2215_v47  ;;  %1620 = vrcp.f32 %v434_v62  ;;  %v2235_v0 = vmul.f32 0.5, %v2170_v34 }
 0x184   :  { %2756 = vst [vmem:[#allocation79_spill] sm:$0xff] %v2224_v19  ;;  %v373_v61 = vand.u32 2147483647, %v2224_v19  ;;  %v921_v25 = vmul.f32 %v1936_v30, %v761_v7  ;;  %v603_v27 = vadd.f32 1.4214138, %v571_v9  ;;  %1622 = vpow2.f32 %v908_v8 }
 0x185   :  { %v538_v33 = vadd.f32 -1.4531521, %v506_v4  ;;  %2757 = vst [vmem:[#allocation80_spill] sm:$0xff] %v2235_v0  ;;  %v435_v6 = vadd.f32 1.0, %v403_v29  ;;  %v696_v14 = vmul.f32 %v1907_v20, %v664_v48  ;;  %v2238_v37 = vpop.eup %1608  ;;  %v910_v21 = vmul.f32 1.442695, %v851_v13 }
 0x186   :  { %2758 = vst [vmem:[#allocation81_spill] sm:$0xff] %v2238_v37  ;;  %v953_v18 = vsub.f32 1.0, %v921_v25  ;;  %v635_v26 = vmul.f32 %v1948_v2, %v603_v27  ;;  %v2242_v62 = vpop.eup %1610  ;;  %v404_v9 = vmul.f32 0.3275911, %v372_v23  ;;  %v821_v7 = vsub.f32 0.0, %v373_v61 }
 0x187   :  { %v570_v47 = vmul.f32 %v1942_v57, %v538_v33  ;;  %2759 = vst [vmem:[#allocation82_spill] sm:$0xff] %v2242_v62  ;;  %v728_v30 = vadd.f32 0.2548296, %v696_v14  ;;  %v2246_v34 = vadd.f32 %v2077_v28, %v1833_v54  ;;  %v2248_v8 = vpop.eup %1612  ;;  %v820_v4 = vsub.f32 0.0, %v372_v23 }
 0x188   :  { %v1017_v29 = vsub.f32 0.0, %v953_v18  ;;  %v667_v13 = vadd.f32 -0.28449672, %v635_v26  ;;  %v2251_v27 = vpop.eup %1614  ;;  %1624 = vrcp.f32 %v435_v6  ;;  %v405_v25 = vmul.f32 0.3275911, %v373_v61 }
 0x189   :  { %2760 = vst [vmem:[#allocation83_spill] sm:$0xff] %v2246_v34  ;;  %v602_v48 = vadd.f32 1.4214138, %v570_v47  ;;  %v760_v33 = vmul.f32 %v1907_v20, %v728_v30  ;;  %v2255_v14 = vmul.f32 0.70710677, %v2246_v34  ;;  %v2257_v19 = vpop.eup %1616  ;;  %1626 = vpow2.f32 %v910_v21 }
 0x18a   :  { %v1049_v54 = vsel %vm985_vm0, %v953_v18, %v1017_v29  ;;  %v699_v28 = vmul.f32 %v1948_v2, %v667_v13  ;;  %v436_v6 = vadd.f32 1.0, %v404_v9  ;;  %v853_v37 = vmul.f32 %v821_v7, %v373_v61  ;;  %v2265_v43 = vpop.eup %1618 }
 0x18b   :  { %2761 = vst [vmem:[#allocation84_spill] sm:$0xff] %v2255_v14  ;;  %v634_v26 = vmul.f32 %v1942_v57, %v602_v48  ;;  %v1081_v47 = vadd.f32 1.0, %v1049_v54  ;;  %v920_v0 = vmul.f32 %v1929_v38, %v760_v33  ;;  %v852_v20 = vmul.f32 %v820_v4, %v372_v23 }
 0x18c   :  { %v731_v30 = vadd.f32 0.2548296, %v699_v28  ;;  %v509_v34 = vmul.f32 1.0614054, %v1984_v59  ;;  %v437_v21 = vadd.f32 1.0, %v405_v25  ;;  %v2276_v9 = vadd.f32 %v2083_v60, %v1835_v56 }
 0x18d   :  { %v666_v62 = vadd.f32 -0.28449672, %v634_v26  ;;  %v1113_v1 = vmul.f32 %v1081_v47, %v1867_v39  ;;  %v952_v18 = vsub.f32 1.0, %v920_v0  ;;  %v374_v29 = vand.u32 2147483647, %v2255_v14  ;;  %v2270_v13 = vpop.eup %1620 }
 0x18e   :  { %v763_v38 = vmul.f32 %v1948_v2, %v731_v30  ;;  %v541_v61 = vadd.f32 -1.4531521, %v509_v34  ;;  %2762 = vst [vmem:[#allocation85_spill] sm:$0xff] %v2276_v9  ;;  %v2278_v7 = vpop.eup %1622  ;;  %1628 = vrcp.f32 %v436_v6  ;;  %v914_v39 = vmul.f32 1.442695, %v853_v37 }
 0x18f   :  { %v698_v23 = vmul.f32 %v1942_v57, %v666_v62  ;;  %1247 = vmatprep.mubr.f32.mxu1 %v1113_v1  ;;  %v1016_v4 = vsub.f32 0.0, %v952_v18  ;;  %v508_v0 = vmul.f32 1.0614054, %v1974_v16  ;;  %v2281_v48 = vmul.f32 1.442695, %v852_v20 }
 0x190   :  { %v923_v33 = vmul.f32 %v1971_v40, %v763_v38  ;;  %v573_v62 = vmul.f32 %v1984_v59, %v541_v61  ;;  %vm986_vm3 = vcmp.ge.f32.partialorder %v1844_v3, 0.0  ;;  %1630 = vrcp.f32 %v437_v21 }
 0x191   :  { %v730_v2 = vadd.f32 0.2548296, %v698_v23  ;;  %v1048_v56 = vsel %vm984_vm1, %v952_v18, %v1016_v4  ;;  %v406_v60 = vmul.f32 0.3275911, %v374_v29  ;;  %v2289_v34 = vmul.f32 0.70710677, %v2276_v9 }
 0x192   :  { %v1080_v37 = vadd.f32 1.0, %v1048_v56  ;;  %v955_v25 = vsub.f32 1.0, %v923_v33  ;;  %v605_v28 = vadd.f32 1.4214138, %v573_v62  ;;  %v2292_v26 = vpop.eup %1624  ;;  %1632 = vpow2.f32 %v914_v39  ;;  %v2773_v9 = vld [vmem:[#allocation37_spill] sm:$0xff] }
 0x193   :  { %2763 = vst [vmem:[#allocation86_spill] sm:$0xff] %v2289_v34  ;;  %v762_v54 = vmul.f32 %v1942_v57, %v730_v2  ;;  %v822_v40 = vsub.f32 0.0, %v374_v29  ;;  %v375_v47 = vand.u32 2147483647, %v2289_v34  ;;  %v540_v6 = vadd.f32 -1.4531521, %v508_v0  ;;  %v2295_v20 = vpop.eup %1626 }
 0x194   :  { %v1112_v63 = vmul.f32 %v1080_v37, %v1864_v32  ;;  %v1019_v30 = vsub.f32 0.0, %v955_v25  ;;  %v637_v18 = vmul.f32 %v1984_v59, %v605_v28  ;;  %v438_v21 = vadd.f32 1.0, %v406_v60  ;;  %v2774_v34 = vld [vmem:[#allocation36_spill] sm:$0xff] }
 0x195   :  { %v922_v1 = vmul.f32 %v1969_v36, %v762_v54  ;;  %v823_v38 = vsub.f32 0.0, %v375_v47  ;;  %v572_v57 = vmul.f32 %v1974_v16, %v540_v6  ;;  %v511_v23 = vmul.f32 1.0614054, %v2025_v10 }
 0x196   :  { %1248 = vmatmul.mubr.f32.vlgmr.msra.gmra.mrb[0].mxu1 %v1112_v63  ;;  %v1051_v61 = vsel %vm987_vm2, %v955_v25, %v1019_v30  ;;  %v669_v39 = vadd.f32 -0.28449672, %v637_v18  ;;  %v510_v0 = vmul.f32 1.0614054, %v2007_v53  ;;  %v2305_v33 = vmul.f32 %v822_v40, %v374_v29 }
 0x197   :  { %v954_v4 = vsub.f32 1.0, %v922_v1  ;;  %v1083_v32 = vadd.f32 1.0, %v1051_v61  ;;  %v855_v36 = vmul.f32 %v823_v38, %v375_v47  ;;  %v604_v2 = vadd.f32 1.4214138, %v572_v57 }
 0x198   :  { %v701_v56 = vmul.f32 %v1984_v59, %v669_v39  ;;  %v543_v60 = vadd.f32 -1.4531521, %v511_v23  ;;  %v542_v37 = vadd.f32 -1.4531521, %v510_v0  ;;  %v2308_v54 = vpop.eup %1628  ;;  %v2311_v12 = vmul.f32 0.3275911, %v375_v47 }
 0x199   :  { %v1018_v62 = vsub.f32 0.0, %v954_v4  ;;  %v1115_v28 = vmul.f32 %v1083_v32, %v1882_v58  ;;  %v2313_v25 = vmul.f32 1.442695, %v855_v36  ;;  %v636_v6 = vmul.f32 %v1974_v16, %v604_v2  ;;  %v2765_v36 = vld [vmem:[#allocation47_spill] sm:$0xff] }
 0x19a   :  { %v733_v40 = vadd.f32 0.2548296, %v701_v56  ;;  %v575_v63 = vmul.f32 %v2025_v10, %v543_v60  ;;  %v574_v30 = vmul.f32 %v2007_v53, %v542_v37  ;;  %v2320_v1 = vpop.eup %1630  ;;  %vm989_vm4 = vcmp.ge.f32.partialorder %v1857_v24, 0.0 }
 0x19b   :  { %v1050_v29 = vsel %vm986_vm3, %v954_v4, %v1018_v62  ;;  %1252 = vmatprep.mubr.f32.mxu1 %v1115_v28  ;;  %1634 = vrcp.f32 %v438_v21  ;;  %v668_v47 = vadd.f32 -0.28449672, %v636_v6  ;;  %v513_v18 = vmul.f32 1.0614054, %v2054_v49  ;;  %v2764_v4 = vld [vmem:[#allocation13_spill] sm:$0xff]  ;;  %v2766_v62 = vld [vmem:[#allocation32_spill] sm:$0xff] }
 0x19c   :  { %v1082_v58 = vadd.f32 1.0, %v1050_v29  ;;  %v765_v38 = vmul.f32 %v1984_v59, %v733_v40  ;;  %v607_v57 = vadd.f32 1.4214138, %v575_v63  ;;  %v606_v3 = vadd.f32 1.4214138, %v574_v30  ;;  %v2326_v61 = vpop.eup %1632  ;;  %v2767_v29 = vld [vmem:[#allocation45_spill] sm:$0xff] }
 0x19d   :  { %v512_v23 = vmul.f32 1.0614054, %v2046_v42  ;;  %v700_v0 = vmul.f32 %v1974_v16, %v668_v47  ;;  %v545_v32 = vadd.f32 -1.4531521, %v513_v18  ;;  %v515_v2 = vmul.f32 1.0614054, %v2765_v36 }
 0x19e   :  { %v1114_v39 = vmul.f32 %v1082_v58, %v2764_v4  ;;  %v925_v21 = vmul.f32 %v2766_v62, %v765_v38  ;;  %v639_v56 = vmul.f32 %v2025_v10, %v607_v57  ;;  %v638_v60 = vmul.f32 %v2007_v53, %v606_v3  ;;  %v2768_v63 = vld [vmem:[#allocation12_spill] sm:$0xff] }
 0x19f   :  { %v544_v59 = vadd.f32 -1.4531521, %v512_v23  ;;  %v732_v37 = vadd.f32 0.2548296, %v700_v0  ;;  %v577_v28 = vmul.f32 %v2054_v49, %v545_v32  ;;  %v547_v6 = vadd.f32 -1.4531521, %v515_v2 }
 0x1a0   :  { %1253 = vmatmul.mubr.f32.gmra.mrb[2].mxu1 %v1114_v39  ;;  %v514_v40 = vmul.f32 1.0614054, %v2767_v29  ;;  %vm988_vm5 = vcmp.ge.f32.partialorder %v2768_v63, 0.0  ;;  %v957_v30 = vsub.f32 1.0, %v925_v21  ;;  %v671_v58 = vadd.f32 -0.28449672, %v639_v56 }
 0x1a1   :  { %v670_v47 = vadd.f32 -0.28449672, %v638_v60  ;;  %v576_v18 = vmul.f32 %v2046_v42, %v544_v59  ;;  %v764_v38 = vmul.f32 %v1974_v16, %v732_v37  ;;  %v609_v57 = vadd.f32 1.4214138, %v577_v28  ;;  %v2769_v2 = vld [vmem:[#allocation30_spill] sm:$0xff]  ;;  %v2777_v63 = vld [vmem:[#allocation23_spill] sm:$0xff] }
 0x1a2   :  { %v579_v3 = vmul.f32 %v2765_v36, %v547_v6  ;;  %v546_v23 = vadd.f32 -1.4531521, %v514_v40  ;;  %v1021_v4 = vsub.f32 0.0, %v957_v30  ;;  %v703_v39 = vmul.f32 %v2025_v10, %v671_v58  ;;  %v2770_v40 = vld [vmem:[#allocation14_spill] sm:$0xff]  ;;  %v2771_v58 = vld [vmem:[#allocation15_spill] sm:$0xff] }
 0x1a3   :  { %v702_v0 = vmul.f32 %v2007_v53, %v670_v47  ;;  %v608_v32 = vadd.f32 1.4214138, %v576_v18  ;;  %v924_v62 = vmul.f32 %v2769_v2, %v764_v38  ;;  %v641_v21 = vmul.f32 %v2054_v49, %v609_v57 }
 0x1a4   :  { %v611_v56 = vadd.f32 1.4214138, %v579_v3  ;;  %v578_v60 = vmul.f32 %v2767_v29, %v546_v23  ;;  %v1053_v16 = vsel %vm989_vm4, %v957_v30, %v1021_v4  ;;  %v735_v59 = vadd.f32 0.2548296, %v703_v39  ;;  %v2772_v4 = vld [vmem:[#allocation19_spill] sm:$0xff] }
 0x1a5   :  { %v734_v37 = vadd.f32 0.2548296, %v702_v0  ;;  %v640_v28 = vmul.f32 %v2046_v42, %v608_v32  ;;  %v2348_v6 = vpop.eup %1634  ;;  %vm990_vm6 = vcmp.ge.f32.partialorder %v2770_v40, 0.0  ;;  %vm991_vm7 = vcmp.ge.f32.partialorder %v2771_v58, 0.0  ;;  %v2782_v58 = vld [vmem:[#allocation21_spill] sm:$0xff] }
 0x1a6   :  { %v1085_v47 = vadd.f32 1.0, %v1053_v16  ;;  %v956_v18 = vsub.f32 1.0, %v924_v62  ;;  %v673_v38 = vadd.f32 -0.28449672, %v641_v21  ;;  %v643_v57 = vmul.f32 %v2765_v36, %v611_v56 }
 0x1a7   :  { %v767_v3 = vmul.f32 %v2025_v10, %v735_v59  ;;  %v766_v24 = vmul.f32 %v2007_v53, %v734_v37  ;;  %v672_v30 = vadd.f32 -0.28449672, %v640_v28  ;;  %v610_v23 = vadd.f32 1.4214138, %v578_v60  ;;  %v2775_v59 = vld [vmem:[#allocation17_spill] sm:$0xff] }
 0x1a8   :  { %v1117_v39 = vmul.f32 %v1085_v47, %v2772_v4  ;;  %v1020_v0 = vsub.f32 0.0, %v956_v18  ;;  %v705_v32 = vmul.f32 %v2054_v49, %v673_v38  ;;  %v675_v2 = vadd.f32 -0.28449672, %v643_v57 }
 0x1a9   :  { %v927_v14 = vmul.f32 %v2773_v9, %v767_v3  ;;  %v926_v16 = vmul.f32 %v2774_v34, %v766_v24  ;;  %v704_v62 = vmul.f32 %v2046_v42, %v672_v30  ;;  %v642_v21 = vmul.f32 %v2767_v29, %v610_v23  ;;  %v2776_v34 = vld [vmem:[#allocation16_spill] sm:$0xff] }
 0x1aa   :  { %1257 = vmatprep.mubr.f32.mxu1 %v1117_v39  ;;  %v1052_v53 = vsel %vm988_vm5, %v956_v18, %v1020_v0  ;;  %v737_v10 = vadd.f32 0.2548296, %v705_v32  ;;  %v707_v56 = vmul.f32 %v2765_v36, %v675_v2  ;;  %v517_v60 = vmul.f32 1.0614054, %v2110_v31  ;;  %v2778_v18 = vld [vmem:[#allocation18_spill] sm:$0xff]  ;;  %v2779_v0 = vld [vmem:[#allocation44_spill] sm:$0xff] }
 0x1ab   :  { %vm993_vm8 = vcmp.ge.f32.partialorder %v2775_v59, 0.0  ;;  %v1084_v37 = vadd.f32 1.0, %v1052_v53  ;;  %v959_v28 = vsub.f32 1.0, %v927_v14  ;;  %v958_v9 = vsub.f32 1.0, %v926_v16 }
 0x1ac   :  { %v736_v47 = vadd.f32 0.2548296, %v704_v62  ;;  %vm992_vm9 = vcmp.ge.f32.partialorder %v2776_v34, 0.0  ;;  %v769_v38 = vmul.f32 %v2054_v49, %v737_v10  ;;  %v739_v57 = vadd.f32 0.2548296, %v707_v56 }
 0x1ad   :  { %v674_v3 = vadd.f32 -0.28449672, %v642_v21  ;;  %v549_v24 = vadd.f32 -1.4531521, %v517_v60  ;;  %vm995_vm10 = vcmp.ge.f32.partialorder %v2777_v63, 0.0  ;;  %v1116_v30 = vmul.f32 %v1084_v37, %v2778_v18  ;;  %v2780_v21 = vld [vmem:[#allocation42_spill] sm:$0xff] }
 0x1ae   :  { %v1023_v23 = vsub.f32 0.0, %v959_v28  ;;  %v1022_v4 = vsub.f32 0.0, %v958_v9  ;;  %v768_v39 = vmul.f32 %v2046_v42, %v736_v47  ;;  %v929_v32 = vmul.f32 %v2779_v0, %v769_v38  ;;  %v2781_v37 = vld [vmem:[#allocation52_spill] sm:$0xff] }
 0x1af   :  { %v771_v14 = vmul.f32 %v2765_v36, %v739_v57  ;;  %v706_v2 = vmul.f32 %v2767_v29, %v674_v3  ;;  %v581_v16 = vmul.f32 %v2110_v31, %v549_v24  ;;  %1258 = vmatmul.mubr.f32.gmra.mrb[4].mxu1 %v1116_v30  ;;  %v516_v10 = vmul.f32 1.0614054, %v2106_v55 }
 0x1b0   :  { %v1055_v49 = vsel %vm991_vm7, %v959_v28, %v1023_v23  ;;  %v1054_v62 = vsel %vm990_vm6, %v958_v9, %v1022_v4  ;;  %v928_v53 = vmul.f32 %v2780_v21, %v768_v39  ;;  %v961_v60 = vsub.f32 1.0, %v929_v32  ;;  %v2783_v28 = vld [vmem:[#allocation22_spill] sm:$0xff]  ;;  %v2784_v9 = vld [vmem:[#allocation20_spill] sm:$0xff] }
 0x1b1   :  { %v1087_v42 = vadd.f32 1.0, %v1055_v49  ;;  %v1086_v56 = vadd.f32 1.0, %v1054_v62  ;;  %v931_v36 = vmul.f32 %v2781_v37, %v771_v14  ;;  %v2383_v47 = vadd.f32 1.0, %v2311_v12  ;;  %v2785_v62 = vld [vmem:[#allocation51_spill] sm:$0xff] }
 0x1b2   :  { %v960_v38 = vsub.f32 1.0, %v928_v53  ;;  %v738_v57 = vadd.f32 0.2548296, %v706_v2  ;;  %v613_v3 = vadd.f32 1.4214138, %v581_v16  ;;  %vm994_vm11 = vcmp.ge.f32.partialorder %v2782_v58, 0.0 }
 0x1b3   :  { %v1119_v40 = vmul.f32 %v1087_v42, %v2783_v28  ;;  %v1118_v24 = vmul.f32 %v1086_v56, %v2784_v9  ;;  %v1025_v18 = vsub.f32 0.0, %v961_v60  ;;  %v963_v30 = vsub.f32 1.0, %v931_v36  ;;  %v2786_v56 = vld [vmem:[#allocation27_spill] sm:$0xff]  ;;  %v2788_v9 = vld [vmem:[#allocation33_spill] sm:$0xff] }
 0x1b4   :  { %v1024_v23 = vsub.f32 0.0, %v960_v38  ;;  %v770_v4 = vmul.f32 %v2767_v29, %v738_v57  ;;  %v645_v39 = vmul.f32 %v2110_v31, %v613_v3  ;;  %v548_v0 = vadd.f32 -1.4531521, %v516_v10  ;;  %v2787_v3 = vld [vmem:[#allocation26_spill] sm:$0xff] }
 0x1b5   :  { %1262 = vmatprep.mubr.f32.mxu1 %v1119_v40  ;;  %v1057_v12 = vsel %vm993_vm8, %v961_v60, %v1025_v18  ;;  %v1027_v32 = vsub.f32 0.0, %v963_v30  ;;  %v519_v14 = vmul.f32 1.0614054, %v2131_v11  ;;  %v518_v2 = vmul.f32 1.0614054, %v2125_v5 }
 0x1b6   :  { %1263 = vmatmul.mubr.f32.gmra.mrb[6].mxu1 %v1118_v24  ;;  %v1089_v16 = vadd.f32 1.0, %v1057_v12  ;;  %v1056_v49 = vsel %vm992_vm9, %v960_v38, %v1024_v23  ;;  %v930_v21 = vmul.f32 %v2785_v62, %v770_v4  ;;  %v677_v29 = vadd.f32 -0.28449672, %v645_v39  ;;  %v2789_v23 = vld [vmem:[#allocation25_spill] sm:$0xff] }
 0x1b7   :  { %v1088_v53 = vadd.f32 1.0, %v1056_v49  ;;  %v1059_v10 = vsel %vm995_vm10, %v963_v30, %v1027_v32  ;;  %v580_v59 = vmul.f32 %v2106_v55, %v548_v0  ;;  %v551_v42 = vadd.f32 -1.4531521, %v519_v14 }
 0x1b8   :  { %v1121_v60 = vmul.f32 %v1089_v16, %v2786_v56  ;;  %v1091_v37 = vadd.f32 1.0, %v1059_v10  ;;  %v962_v36 = vsub.f32 1.0, %v930_v21  ;;  %v709_v57 = vmul.f32 %v2110_v31, %v677_v29  ;;  %v2790_v56 = vld [vmem:[#allocation31_spill] sm:$0xff] }
 0x1b9   :  { %v1120_v28 = vmul.f32 %v1088_v53, %v2787_v3  ;;  %v612_v34 = vadd.f32 1.4214138, %v580_v59  ;;  %v583_v38 = vmul.f32 %v2131_v11, %v551_v42  ;;  %v550_v40 = vadd.f32 -1.4531521, %v518_v2 }
 0x1ba   :  { %1267 = vmatprep.mubr.f32.mxu1 %v1121_v60  ;;  %v1123_v24 = vmul.f32 %v1091_v37, %v2788_v9  ;;  %v1026_v63 = vsub.f32 0.0, %v962_v36  ;;  %v741_v18 = vadd.f32 0.2548296, %v709_v57  ;;  %v521_v30 = vmul.f32 1.0614054, %v2160_v52  ;;  %v2791_v9 = vld [vmem:[#allocation24_spill] sm:$0xff] }
 0x1bb   :  { %vm997_vm12 = vcmp.ge.f32.partialorder %v2789_v23, 0.0  ;;  %1268 = vmatmul.mubr.f32.gmra.mrb[8].mxu1 %v1120_v28  ;;  %v644_v4 = vmul.f32 %v2106_v55, %v612_v34  ;;  %v615_v39 = vadd.f32 1.4214138, %v583_v38  ;;  %v582_v0 = vmul.f32 %v2125_v5, %v550_v40 }
 0x1bc   :  { %v520_v12 = vmul.f32 1.0614054, %v2155_v17  ;;  %1272 = vmatprep.mubr.f32.mxu1 %v1123_v24  ;;  %v1058_v32 = vsel %vm994_vm11, %v962_v36, %v1026_v63  ;;  %v773_v14 = vmul.f32 %v2110_v31, %v741_v18  ;;  %v553_v2 = vadd.f32 -1.4531521, %v521_v30 }
 0x1bd   :  { %v523_v16 = vmul.f32 1.0614054, %v2181_v45  ;;  %v1090_v49 = vadd.f32 1.0, %v1058_v32  ;;  %v676_v62 = vadd.f32 -0.28449672, %v644_v4  ;;  %v647_v21 = vmul.f32 %v2131_v11, %v615_v39  ;;  %v2792_v32 = vld [vmem:[#allocation29_spill] sm:$0xff] }
 0x1be   :  { %v614_v29 = vadd.f32 1.4214138, %v582_v0  ;;  %v933_v53 = vmul.f32 %v2120_v44, %v773_v14  ;;  %v585_v10 = vmul.f32 %v2160_v52, %v553_v2  ;;  %v552_v59 = vadd.f32 -1.4531521, %v520_v12 }
 0x1bf   :  { %v555_v42 = vadd.f32 -1.4531521, %v523_v16  ;;  %v1122_v60 = vmul.f32 %v1090_v49, %v2790_v56  ;;  %v708_v58 = vmul.f32 %v2106_v55, %v676_v62  ;;  %v679_v37 = vadd.f32 -0.28449672, %v647_v21  ;;  %v2794_v56 = vld [vmem:[#allocation41_spill] sm:$0xff] }
 0x1c0   :  { %v646_v31 = vmul.f32 %v2125_v5, %v614_v29  ;;  %v965_v36 = vsub.f32 1.0, %v933_v53  ;;  %v617_v57 = vadd.f32 1.4214138, %v585_v10  ;;  %v584_v3 = vmul.f32 %v2155_v17, %v552_v59  ;;  %v2793_v53 = vld [vmem:[#allocation28_spill] sm:$0xff] }
 0x1c1   :  { %v587_v28 = vmul.f32 %v2181_v45, %v555_v42  ;;  %1273 = vmatmul.mubr.f32.gmra.mrb[10].mxu1 %v1122_v60  ;;  %v740_v34 = vadd.f32 0.2548296, %v708_v58  ;;  %v711_v44 = vmul.f32 %v2131_v11, %v679_v37  ;;  %v522_v40 = vmul.f32 1.0614054, %v2175_v15  ;;  %v2795_v37 = vld [vmem:[#allocation63_spill] sm:$0xff] }
 0x1c2   :  { %v678_v38 = vadd.f32 -0.28449672, %v646_v31  ;;  %vm996_vm13 = vcmp.ge.f32.partialorder %v2791_v9, 0.0  ;;  %v1029_v24 = vsub.f32 0.0, %v965_v36  ;;  %v649_v63 = vmul.f32 %v2160_v52, %v617_v57 }
 0x1c3   :  { %v616_v18 = vadd.f32 1.4214138, %v584_v3  ;;  %v619_v30 = vadd.f32 1.4214138, %v587_v28  ;;  %v772_v4 = vmul.f32 %v2106_v55, %v740_v34  ;;  %v743_v39 = vadd.f32 0.2548296, %v711_v44 }
 0x1c4   :  { %v710_v0 = vmul.f32 %v2125_v5, %v678_v38  ;;  %v554_v12 = vadd.f32 -1.4531521, %v522_v40  ;;  %vm999_vm14 = vcmp.ge.f32.partialorder %v2792_v32, 0.0  ;;  %v1061_v14 = vsel %vm997_vm12, %v965_v36, %v1029_v24  ;;  %v2796_v28 = vld [vmem:[#allocation35_spill] sm:$0xff]  ;;  %v2797_v38 = vld [vmem:[#allocation61_spill] sm:$0xff]  ;;  %v2804_v32 = vld [vmem:[#allocation46_spill] sm:$0xff] }
 0x1c5   :  { %v681_v2 = vadd.f32 -0.28449672, %v649_v63  ;;  %v648_v16 = vmul.f32 %v2155_v17, %v616_v18  ;;  %v651_v49 = vmul.f32 %v2181_v45, %v619_v30  ;;  %v1093_v62 = vadd.f32 1.0, %v1061_v14 }
 0x1c6   :  { %v932_v21 = vmul.f32 %v2112_v35, %v772_v4  ;;  %v775_v29 = vmul.f32 %v2131_v11, %v743_v39  ;;  %v742_v55 = vadd.f32 0.2548296, %v710_v0  ;;  %vm998_vm15 = vcmp.ge.f32.partialorder %v2793_v53, 0.0  ;;  %v2798_v4 = vld [vmem:[#allocation34_spill] sm:$0xff]  ;;  %v2806_v53 = vld [vmem:[#allocation43_spill] sm:$0xff] }
 0x1c7   :  { %v713_v10 = vmul.f32 %v2160_v52, %v681_v2  ;;  %v680_v59 = vadd.f32 -0.28449672, %v648_v16  ;;  %v683_v42 = vadd.f32 -0.28449672, %v651_v49  ;;  %v586_v23 = vmul.f32 %v2175_v15, %v554_v12  ;;  %v2799_v2 = vld [vmem:[#allocation40_spill] sm:$0xff] }
 0x1c8   :  { %v1125_v60 = vmul.f32 %v1093_v62, %v2794_v56  ;;  %v964_v58 = vsub.f32 1.0, %v932_v21  ;;  %v935_v31 = vmul.f32 %v2795_v37, %v775_v29  ;;  %v774_v36 = vmul.f32 %v2125_v5, %v742_v55  ;;  %v2800_v49 = vld [vmem:[#allocation68_spill] sm:$0xff] }
 0x1c9   :  { %v745_v57 = vadd.f32 0.2548296, %v713_v10  ;;  %v712_v35 = vmul.f32 %v2155_v17, %v680_v59  ;;  %v715_v11 = vmul.f32 %v2181_v45, %v683_v42  ;;  %v618_v3 = vadd.f32 1.4214138, %v586_v23  ;;  %v2801_v59 = vld [vmem:[#allocation39_spill] sm:$0xff] }
 0x1ca   :  { %vm1001_vm0 = vcmp.ge.f32.partialorder %v2796_v28, 0.0  ;;  %1277 = vmatprep.mubr.f32.mxu1 %v1125_v60  ;;  %v1028_v34 = vsub.f32 0.0, %v964_v58  ;;  %v967_v44 = vsub.f32 1.0, %v935_v31  ;;  %v934_v40 = vmul.f32 %v2797_v38, %v774_v36  ;;  %v2802_v60 = vld [vmem:[#allocation67_spill] sm:$0xff]  ;;  %v2803_v31 = vld [vmem:[#allocation73_spill] sm:$0xff] }
 0x1cb   :  { %v525_v24 = vmul.f32 1.0614054, %v2208_v22  ;;  %v777_v63 = vmul.f32 %v2160_v52, %v745_v57  ;;  %v744_v18 = vadd.f32 0.2548296, %v712_v35  ;;  %v747_v30 = vadd.f32 0.2548296, %v715_v11 }
 0x1cc   :  { %v650_v5 = vmul.f32 %v2175_v15, %v618_v3  ;;  %vm1000_vm1 = vcmp.ge.f32.partialorder %v2798_v4, 0.0  ;;  %v1060_v39 = vsel %vm996_vm13, %v964_v58, %v1028_v34  ;;  %v1031_v0 = vsub.f32 0.0, %v967_v44 }
 0x1cd   :  { %v966_v12 = vsub.f32 1.0, %v934_v40  ;;  %v557_v14 = vadd.f32 -1.4531521, %v525_v24  ;;  %vm1003_vm2 = vcmp.ge.f32.partialorder %v2799_v2, 0.0  ;;  %v1092_v16 = vadd.f32 1.0, %v1060_v39  ;;  %v2805_v24 = vld [vmem:[#allocation38_spill] sm:$0xff] }
 0x1ce   :  { %v937_v62 = vmul.f32 %v2800_v49, %v777_v63  ;;  %v776_v21 = vmul.f32 %v2155_v17, %v744_v18  ;;  %v779_v52 = vmul.f32 %v2181_v45, %v747_v30  ;;  %v1063_v29 = vsel %vm999_vm14, %v967_v44, %v1031_v0 }
 0x1cf   :  { %v1030_v55 = vsub.f32 0.0, %v966_v12  ;;  %v682_v10 = vadd.f32 -0.28449672, %v650_v5  ;;  %v589_v9 = vmul.f32 %v2208_v22, %v557_v14  ;;  %v1124_v42 = vmul.f32 %v1092_v16, %v2801_v59 }
 0x1d0   :  { %v1095_v23 = vadd.f32 1.0, %v1063_v29  ;;  %v969_v56 = vsub.f32 1.0, %v937_v62  ;;  %v936_v58 = vmul.f32 %v2802_v60, %v776_v21  ;;  %v939_v17 = vmul.f32 %v2803_v31, %v779_v52  ;;  %v2807_v52 = vld [vmem:[#allocation54_spill] sm:$0xff]  ;;  %v2810_v31 = vld [vmem:[#allocation57_spill] sm:$0xff] }
 0x1d1   :  { %v1062_v37 = vsel %vm998_vm15, %v966_v12, %v1030_v55  ;;  %v714_v45 = vmul.f32 %v2175_v15, %v682_v10  ;;  %v621_v36 = vadd.f32 1.4214138, %v589_v9  ;;  %1278 = vmatmul.mubr.f32.gmra.mrb[12].mxu1 %v1124_v42  ;;  %v524_v40 = vmul.f32 1.0614054, %v2201_v51  ;;  %v2808_v10 = vld [vmem:[#allocation72_spill] sm:$0xff] }
 0x1d2   :  { %v1127_v57 = vmul.f32 %v1095_v23, %v2804_v32  ;;  %v1094_v35 = vadd.f32 1.0, %v1062_v37  ;;  %v1033_v11 = vsub.f32 0.0, %v969_v56  ;;  %v968_v3 = vsub.f32 1.0, %v936_v58  ;;  %v2809_v23 = vld [vmem:[#allocation48_spill] sm:$0xff]  ;;  %v2811_v32 = vld [vmem:[#allocation50_spill] sm:$0xff] }
 0x1d3   :  { %v971_v34 = vsub.f32 1.0, %v939_v17  ;;  %v746_v44 = vadd.f32 0.2548296, %v714_v45  ;;  %v653_v38 = vmul.f32 %v2208_v22, %v621_v36  ;;  %vm1002_vm3 = vcmp.ge.f32.partialorder %v2805_v24, 0.0 }
 0x1d4   :  { %1282 = vmatprep.mubr.f32.mxu1 %v1127_v57  ;;  %v1126_v63 = vmul.f32 %v1094_v35, %v2806_v53  ;;  %v1065_v18 = vsel %vm1001_vm0, %v969_v56, %v1033_v11  ;;  %v1032_v30 = vsub.f32 0.0, %v968_v3  ;;  %v527_v5 = vmul.f32 1.0614054, %v2229_v50 }
 0x1d5   :  { %v1097_v39 = vadd.f32 1.0, %v1065_v18  ;;  %v1035_v0 = vsub.f32 0.0, %v971_v34  ;;  %v778_v12 = vmul.f32 %v2175_v15, %v746_v44  ;;  %v685_v14 = vadd.f32 -0.28449672, %v653_v38 }
 0x1d6   :  { %1283 = vmatmul.mubr.f32.gmra.mrb[14].mxu1 %v1126_v63  ;;  %v1064_v16 = vsel %vm1000_vm1, %v968_v3, %v1032_v30  ;;  %v556_v49 = vadd.f32 -1.4531521, %v524_v40  ;;  %v559_v62 = vadd.f32 -1.4531521, %v527_v5  ;;  %v526_v21 = vmul.f32 1.0614054, %v2219_v46 }
 0x1d7   :  { %v1129_v29 = vmul.f32 %v1097_v39, %v2807_v52  ;;  %v1096_v28 = vadd.f32 1.0, %v1064_v16  ;;  %v1067_v55 = vsel %vm1003_vm2, %v971_v34, %v1035_v0  ;;  %v938_v9 = vmul.f32 %v2808_v10, %v778_v12 }
 0x1d8   :  { %v1099_v59 = vadd.f32 1.0, %v1067_v55  ;;  %v717_v15 = vmul.f32 %v2208_v22, %v685_v14  ;;  %v588_v42 = vmul.f32 %v2201_v51, %v556_v49  ;;  %v591_v4 = vmul.f32 %v2229_v50, %v559_v62  ;;  %v2812_v62 = vld [vmem:[#allocation56_spill] sm:$0xff] }
 0x1d9   :  { %1287 = vmatprep.mubr.f32.mxu1 %v1129_v29  ;;  %v1128_v56 = vmul.f32 %v1096_v28, %v2809_v23  ;;  %v970_v60 = vsub.f32 1.0, %v938_v9  ;;  %v558_v58 = vadd.f32 -1.4531521, %v526_v21  ;;  %v529_v37 = vmul.f32 1.0614054, %v2251_v27 }
 0x1da   :  { %v1131_v17 = vmul.f32 %v1099_v59, %v2810_v31  ;;  %v749_v2 = vadd.f32 0.2548296, %v717_v15  ;;  %v620_v45 = vadd.f32 1.4214138, %v588_v42  ;;  %v623_v36 = vadd.f32 1.4214138, %v591_v4 }
 0x1db   :  { %vm1005_vm4 = vcmp.ge.f32.partialorder %v2811_v32, 0.0  ;;  %1288 = vmatmul.mubr.f32.gmra.mrb[16].mxu1 %v1128_v56  ;;  %v1034_v57 = vsub.f32 0.0, %v970_v60  ;;  %v590_v35 = vmul.f32 %v2219_v46, %v558_v58  ;;  %v561_v11 = vadd.f32 -1.4531521, %v529_v37  ;;  %v2813_v42 = vld [vmem:[#allocation49_spill] sm:$0xff]  ;;  %v2814_v4 = vld [vmem:[#allocation55_spill] sm:$0xff] }
 0x1dc   :  { %v528_v3 = vmul.f32 1.0614054, %v2248_v8  ;;  %1292 = vmatprep.mubr.f32.mxu1 %v1131_v17  ;;  %v781_v34 = vmul.f32 %v2208_v22, %v749_v2  ;;  %v652_v44 = vmul.f32 %v2201_v51, %v620_v45  ;;  %v655_v38 = vmul.f32 %v2229_v50, %v623_v36 }
 0x1dd   :  { %v531_v40 = vmul.f32 1.0614054, %v2292_v26  ;;  %v1066_v53 = vsel %vm1002_vm3, %v970_v60, %v1034_v57  ;;  %v622_v63 = vadd.f32 1.4214138, %v590_v35  ;;  %v593_v18 = vmul.f32 %v2251_v27, %v561_v11  ;;  %v2815_v35 = vld [vmem:[#allocation53_spill] sm:$0xff] }
 0x1de   :  { %v560_v30 = vadd.f32 -1.4531521, %v528_v3  ;;  %v1098_v5 = vadd.f32 1.0, %v1066_v53  ;;  %v941_v39 = vmul.f32 %v2217_v41, %v781_v34  ;;  %v684_v0 = vadd.f32 -0.28449672, %v652_v44  ;;  %v2816_v11 = vld [vmem:[#allocation77_spill] sm:$0xff] }
 0x1df   :  { %v687_v12 = vadd.f32 -0.28449672, %v655_v38  ;;  %v654_v22 = vmul.f32 %v2219_v46, %v622_v63  ;;  %v625_v14 = vadd.f32 1.4214138, %v593_v18  ;;  %v563_v49 = vadd.f32 -1.4531521, %v531_v40 }
 0x1e0   :  { %v592_v16 = vmul.f32 %v2248_v8, %v560_v30  ;;  %v1130_v21 = vmul.f32 %v1098_v5, %v2812_v62  ;;  %v973_v52 = vsub.f32 1.0, %v941_v39  ;;  %v716_v24 = vmul.f32 %v2201_v51, %v684_v0  ;;  %v2817_v34 = vld [vmem:[#allocation82_spill] sm:$0xff]  ;;  %v2818_v40 = vld [vmem:[#allocation59_spill] sm:$0xff] }
 0x1e1   :  { %v719_v29 = vmul.f32 %v2229_v50, %v687_v12  ;;  %v686_v28 = vadd.f32 -0.28449672, %v654_v22  ;;  %v657_v55 = vmul.f32 %v2251_v27, %v625_v14  ;;  %v595_v41 = vmul.f32 %v2292_v26, %v563_v49  ;;  %v2819_v18 = vld [vmem:[#allocation62_spill] sm:$0xff]  ;;  %v2820_v12 = vld [vmem:[#allocation81_spill] sm:$0xff] }
 0x1e2   :  { %v624_v10 = vadd.f32 1.4214138, %v592_v16  ;;  %1636 = vrcp.f32 %v2383_v47  ;;  %1293 = vmatmul.mubr.f32.gmra.mrb[18].mxu1 %v1130_v21  ;;  %v1037_v9 = vsub.f32 0.0, %v973_v52  ;;  %v748_v59 = vadd.f32 0.2548296, %v716_v24  ;;  %v2821_v24 = vld [vmem:[#allocation60_spill] sm:$0xff] }
 0x1e3   :  { %v751_v15 = vadd.f32 0.2548296, %v719_v29  ;;  %vm1004_vm5 = vcmp.ge.f32.partialorder %v2813_v42, 0.0  ;;  %vm1007_vm6 = vcmp.ge.f32.partialorder %v2814_v4, 0.0  ;;  %v718_v23 = vmul.f32 %v2219_v46, %v686_v28  ;;  %v2824_v4 = vld [vmem:[#allocation69_spill] sm:$0xff] }
 0x1e4   :  { %v689_v56 = vadd.f32 -0.28449672, %v657_v55  ;;  %v656_v60 = vmul.f32 %v2248_v8, %v624_v10  ;;  %v627_v58 = vadd.f32 1.4214138, %v595_v41  ;;  %v1069_v37 = vsel %vm1005_vm4, %v973_v52, %v1037_v9 }
 0x1e5   :  { %v780_v31 = vmul.f32 %v2201_v51, %v748_v59  ;;  %v783_v47 = vmul.f32 %v2229_v50, %v751_v15  ;;  %v530_v17 = vmul.f32 1.0614054, %v2270_v13  ;;  %v1101_v2 = vadd.f32 1.0, %v1069_v37 }
 0x1e6   :  { %v750_v45 = vadd.f32 0.2548296, %v718_v23  ;;  %v721_v36 = vmul.f32 %v2251_v27, %v689_v56  ;;  %v688_v57 = vadd.f32 -0.28449672, %v656_v60  ;;  %vm1006_vm7 = vcmp.ge.f32.partialorder %v2815_v35, 0.0  ;;  %v2822_v23 = vld [vmem:[#allocation71_spill] sm:$0xff] }
 0x1e7   :  { %v940_v3 = vmul.f32 %v2816_v11, %v780_v31  ;;  %v943_v44 = vmul.f32 %v2817_v34, %v783_v47  ;;  %v659_v32 = vmul.f32 %v2292_v26, %v627_v58  ;;  %v562_v38 = vadd.f32 -1.4531521, %v530_v17  ;;  %v2823_v47 = vld [vmem:[#allocation58_spill] sm:$0xff] }
 0x1e8   :  { %v1133_v51 = vmul.f32 %v1101_v2, %v2818_v40  ;;  %v782_v50 = vmul.f32 %v2219_v46, %v750_v45  ;;  %v753_v53 = vadd.f32 0.2548296, %v721_v36  ;;  %v720_v63 = vmul.f32 %v2248_v8, %v688_v57 }
 0x1e9   :  { %vm1009_vm8 = vcmp.ge.f32.partialorder %v2819_v18, 0.0  ;;  %v972_v30 = vsub.f32 1.0, %v940_v3  ;;  %v975_v5 = vsub.f32 1.0, %v943_v44  ;;  %v691_v39 = vadd.f32 -0.28449672, %v659_v32 }
 0x1ea   :  { %v594_v0 = vmul.f32 %v2270_v13, %v562_v38  ;;  %1297 = vmatprep.mubr.f32.mxu1 %v1133_v51  ;;  %v942_v22 = vmul.f32 %v2820_v12, %v782_v50  ;;  %v785_v14 = vmul.f32 %v2251_v27, %v753_v53  ;;  %v752_v16 = vadd.f32 0.2548296, %v720_v63  ;;  %v2825_v38 = vld [vmem:[#allocation65_spill] sm:$0xff] }
 0x1eb   :  { %v533_v49 = vmul.f32 1.0614054, %v2320_v1  ;;  %v1036_v62 = vsub.f32 0.0, %v972_v30  ;;  %v1039_v46 = vsub.f32 0.0, %v975_v5  ;;  %v723_v21 = vmul.f32 %v2292_v26, %v691_v39 }
 0x1ec   :  { %v626_v52 = vadd.f32 1.4214138, %v594_v0  ;;  %vm1008_vm9 = vcmp.ge.f32.partialorder %v2821_v24, 0.0  ;;  %v974_v29 = vsub.f32 1.0, %v942_v22  ;;  %v945_v28 = vmul.f32 %v2265_v43, %v785_v14  ;;  %v2531_v41 = vpop.eup %1636  ;;  %v2827_v24 = vld [vmem:[#allocation70_spill] sm:$0xff] }
 0x1ed   :  { %v784_v55 = vmul.f32 %v2248_v8, %v752_v16  ;;  %v565_v10 = vadd.f32 -1.4531521, %v533_v49  ;;  %v1068_v27 = vsel %vm1004_vm5, %v972_v30, %v1036_v62  ;;  %v1071_v9 = vsel %vm1007_vm6, %v975_v5, %v1039_v46  ;;  %v2826_v5 = vld [vmem:[#allocation74_spill] sm:$0xff] }
 0x1ee   :  { %v755_v59 = vadd.f32 0.2548296, %v723_v21  ;;  %v658_v15 = vmul.f32 %v2270_v13, %v626_v52  ;;  %vm1011_vm10 = vcmp.ge.f32.partialorder %v2822_v23, 0.0  ;;  %v1100_v56 = vadd.f32 1.0, %v1068_v27 }
 0x1ef   :  { %v1103_v60 = vadd.f32 1.0, %v1071_v9  ;;  %v1038_v58 = vsub.f32 0.0, %v974_v29  ;;  %v977_v43 = vsub.f32 1.0, %v945_v28  ;;  %v944_v8 = vmul.f32 %v2257_v19, %v784_v55  ;;  %v2828_v9 = vld [vmem:[#allocation80_spill] sm:$0xff] }
 0x1f0   :  { %v787_v37 = vmul.f32 %v2292_v26, %v755_v59  ;;  %v690_v31 = vadd.f32 -0.28449672, %v658_v15  ;;  %v597_v42 = vmul.f32 %v2320_v1, %v565_v10  ;;  %v1132_v17 = vmul.f32 %v1100_v56, %v2823_v47 }
 0x1f1   :  { %v1135_v2 = vmul.f32 %v1103_v60, %v2824_v4  ;;  %v1070_v45 = vsel %vm1006_vm7, %v974_v29, %v1038_v58  ;;  %v1041_v36 = vsub.f32 0.0, %v977_v43  ;;  %v976_v11 = vsub.f32 1.0, %v944_v8 }
 0x1f2   :  { %v1102_v57 = vadd.f32 1.0, %v1070_v45  ;;  %v947_v3 = vmul.f32 %v2295_v20, %v787_v37  ;;  %v722_v34 = vmul.f32 %v2270_v13, %v690_v31  ;;  %1298 = vmatmul.mubr.f32.gmra.mrb[20].mxu1 %v1132_v17  ;;  %v629_v26 = vadd.f32 1.4214138, %v597_v42  ;;  %v2830_v31 = vld [vmem:[#allocation64_spill] sm:$0xff] }
 0x1f3   :  { %v1073_v19 = vsel %vm1009_vm8, %v977_v43, %v1041_v36  ;;  %v532_v44 = vmul.f32 1.0614054, %v2308_v54  ;;  %v535_v32 = vmul.f32 1.0614054, %v2531_v41  ;;  %1302 = vmatprep.mubr.f32.mxu1 %v1135_v2  ;;  %v1040_v51 = vsub.f32 0.0, %v976_v11  ;;  %v2829_v43 = vld [vmem:[#allocation66_spill] sm:$0xff] }
 0x1f4   :  { %v1134_v35 = vmul.f32 %v1102_v57, %v2825_v38  ;;  %v1105_v40 = vadd.f32 1.0, %v1073_v19  ;;  %v979_v50 = vsub.f32 1.0, %v947_v3  ;;  %v754_v53 = vadd.f32 0.2548296, %v722_v34 }
 0x1f5   :  { %v661_v20 = vmul.f32 %v2320_v1, %v629_v26  ;;  %v564_v63 = vadd.f32 -1.4531521, %v532_v44  ;;  %v567_v30 = vadd.f32 -1.4531521, %v535_v32  ;;  %v1072_v18 = vsel %vm1008_vm9, %v976_v11, %v1040_v51  ;;  %v2831_v44 = vld [vmem:[#allocation79_spill] sm:$0xff] }
 0x1f6   :  { %v1137_v39 = vmul.f32 %v1105_v40, %v2826_v5  ;;  %v1043_v0 = vsub.f32 0.0, %v979_v50  ;;  %v534_v12 = vmul.f32 1.0614054, %v2348_v6  ;;  %1303 = vmatmul.mubr.f32.gmra.mrb[22].mxu1 %v1134_v35  ;;  %v1104_v22 = vadd.f32 1.0, %v1072_v18  ;;  %v2832_v40 = vld [vmem:[#allocation76_spill] sm:$0xff] }
 0x1f7   :  { %v786_v14 = vmul.f32 %v2270_v13, %v754_v53  ;;  %v693_v16 = vadd.f32 -0.28449672, %v661_v20  ;;  %v596_v49 = vmul.f32 %v2308_v54, %v564_v63  ;;  %v916_v62 = vmul.f32 1.442695, %v2305_v33 }
 0x1f8   :  { %1307 = vmatprep.mubr.f32.mxu1 %v1137_v39  ;;  %v1075_v46 = vsel %vm1011_vm10, %v979_v50, %v1043_v0  ;;  %v599_v21 = vmul.f32 %v2531_v41, %v567_v30  ;;  %v566_v52 = vadd.f32 -1.4531521, %v534_v12  ;;  %v1136_v29 = vmul.f32 %v1104_v22, %v2827_v24  ;;  %v2836_v24 = vld [vmem:[#allocation84_spill] sm:$0xff] }
 0x1f9   :  { %v1107_v28 = vadd.f32 1.0, %v1075_v46  ;;  %v946_v55 = vmul.f32 %v2278_v7, %v786_v14  ;;  %v725_v10 = vmul.f32 %v2320_v1, %v693_v16  ;;  %1638 = vpow2.f32 %v2281_v48  ;;  %v2834_v16 = vld [vmem:[#allocation86_spill] sm:$0xff] }
 0x1fa   :  { %v628_v13 = vadd.f32 1.4214138, %v596_v49  ;;  %v631_v27 = vadd.f32 1.4214138, %v599_v21  ;;  %v598_v33 = vmul.f32 %v2348_v6, %v566_v52  ;;  %1640 = vpow2.f32 %v2313_v25  ;;  %1308 = vmatmul.mubr.f32.gmra.mrb[24].mxu1 %v1136_v29  ;;  %v2835_v49 = vld [vmem:[#allocation75_spill] sm:$0xff] }
 0x1fb   :  { %v1139_v59 = vmul.f32 %v1107_v28, %v2828_v9  ;;  %v978_v15 = vsub.f32 1.0, %v946_v55  ;;  %v757_v23 = vadd.f32 0.2548296, %v725_v10  ;;  %1642 = vpow2.f32 %v916_v62  ;;  %v2838_v9 = vld [vmem:[#allocation83_spill] sm:$0xff] }
 0x1fc   :  { %v660_v56 = vmul.f32 %v2308_v54, %v628_v13  ;;  %v663_v60 = vmul.f32 %v2531_v41, %v631_v27  ;;  %v630_v7 = vadd.f32 1.4214138, %v598_v33  ;;  %vm1010_vm11 = vcmp.ge.f32.partialorder %v2829_v43, 0.0 }
 0x1fd   :  { %1312 = vmatprep.mubr.f32.mxu1 %v1139_v59  ;;  %v1042_v58 = vsub.f32 0.0, %v978_v15  ;;  %v789_v48 = vmul.f32 %v2320_v1, %v757_v23  ;;  %v306_v42 = vmul.f32 0.5, %v2830_v31  ;;  %vm1013_vm12 = vcmp.ge.f32.partialorder %v2831_v44, 0.0 }
 0x1fe   :  { %v692_v8 = vadd.f32 -0.28449672, %v660_v56  ;;  %v695_v37 = vadd.f32 -0.28449672, %v663_v60  ;;  %v662_v25 = vmul.f32 %v2348_v6, %v630_v7  ;;  %v309_v51 = vmul.f32 0.5, %v2832_v40 }
 0x1ff   :  { %v1074_v47 = vsel %vm1010_vm11, %v978_v15, %v1042_v58  ;;  %v949_v17 = vmul.f32 %v2326_v61, %v789_v48  ;;  %vm1015_vm14 = vcmp.ge.f32.partialorder %v2834_v16, 0.0  ;;  %v308_v62 = vmul.f32 0.5, %v2835_v49  ;;  %v2595_v56 = vld [vmem:[%s2631_s3 + $0x2] ss:$0 sm:$0xff]  ;;  %s1746_s3 = smov [#allocation8]  }
 0x200   :  { %v1106_v4 = vadd.f32 1.0, %v1074_v47  ;;  %v724_v2 = vmul.f32 %v2308_v54, %v692_v8  ;;  %v727_v45 = vmul.f32 %v2531_v41, %v695_v37  ;;  %v694_v36 = vadd.f32 -0.28449672, %v662_v25  ;;  %s1349_s30 = sshll.u32 %s1746_s3, 4  ;;  %s1350_s30 = int_to_ptr.vmem [resolvable:$true] %s1349_s30 }
 0x201   :  { %v981_v57 = vsub.f32 1.0, %v949_v17  ;;  %vm1014_vm15 = vcmp.ge.f32.partialorder %v2836_v24, 0.0  ;;  %v310_v59 = vmul.f32 0.5, %v2838_v9  ;;  %s1710_s5 = scalar_lea.vmem %s1350_s30, 2048  ;;  %p1715_p11 = scmp.lt.s32.totalorder %s1350_s30, %s1350_s30 }
 0x202   :  { %v1138_v11 = vmul.f32 %v1106_v4, %v306_v42  ;;  %v756_v1 = vadd.f32 0.2548296, %v724_v2  ;;  %v759_v3 = vadd.f32 0.2548296, %v727_v45  ;;  %v726_v34 = vmul.f32 %v2348_v6, %v694_v36  ;;  %p1711_p10 = scmp.ne.s32.totalorder %s1350_s30, %s1710_s5  ;;  %p1716_p12 = scmp.lt.s32.totalorder %s1710_s5, %s1710_s5 }
 0x203   :  { %v1045_v19 = vsub.f32 0.0, %v981_v57  ;;  %v1639_v26 = vpop.eup %1638 }
 0x204   :  { %1313 = vmatmul.mubr.f32.gmra.mrb[26].mxu1 %v1138_v11  ;;  %v788_v32 = vmul.f32 %v2308_v54, %v756_v1  ;;  %v791_v61 = vmul.f32 %v2531_v41, %v759_v3  ;;  %v758_v38 = vadd.f32 0.2548296, %v726_v34  ;;  %v1641_v35 = vpop.eup %1640  ;;  %v2833_v41 = vld [vmem:[#allocation78_spill] sm:$0xff]  ;;  %p1717_p13 = por %p1716_p12, %p1715_p11 }
 0x205   :  { %v1077_v50 = vsel %vm1013_vm12, %v981_v57, %v1045_v19  ;;  %v1643_v5 = vpop.eup %1642  ;;  %vm1012_vm13 = vcmp.ge.f32.partialorder %v2833_v41, 0.0 }
 0x206   :  { %v1109_v53 = vadd.f32 1.0, %v1077_v50  ;;  %v948_v20 = vmul.f32 %v1639_v26, %v788_v32  ;;  %v951_v63 = vmul.f32 %v1641_v35, %v791_v61  ;;  %v790_v30 = vmul.f32 %v2348_v6, %v758_v38  ;;  %v2837_v6 = vld [vmem:[#allocation85_spill] sm:$0xff]  ;;  %p1718_p0 = pnand %p1717_p13, %p1711_p10 }
 0x207   :  { %v311_v29 = vmul.f32 0.5, %v2837_v6 }
 0x208   :  { %v1141_v39 = vmul.f32 %v1109_v53, %v309_v51  ;;  %v980_v18 = vsub.f32 1.0, %v948_v20  ;;  %v983_v0 = vsub.f32 1.0, %v951_v63  ;;  %v950_v12 = vmul.f32 %v1643_v5, %v790_v30 }
 0x20a   :  { %1317 = vmatprep.mubr.f32.mxu1 %v1141_v39  ;;  %v1044_v22 = vsub.f32 0.0, %v980_v18  ;;  %v1047_v54 = vsub.f32 0.0, %v983_v0  ;;  %v982_v14 = vsub.f32 1.0, %v950_v12 }
 0x20c   :  { %v1076_v46 = vsel %vm1012_vm13, %v980_v18, %v1044_v22  ;;  %v1079_v21 = vsel %vm1015_vm14, %v983_v0, %v1047_v54  ;;  %v1046_v52 = vsub.f32 0.0, %v982_v14 }
 0x20d   :  { %v1108_v28 = vadd.f32 1.0, %v1076_v46  ;;  %v1111_v55 = vadd.f32 1.0, %v1079_v21 }
 0x20e   :  { %v1078_v10 = vsel %vm1014_vm15, %v982_v14, %v1046_v52 }
 0x20f   :  { %v1140_v13 = vmul.f32 %v1108_v28, %v308_v62  ;;  %v1143_v27 = vmul.f32 %v1111_v55, %v311_v29  ;;  %v1110_v33 = vadd.f32 1.0, %v1078_v10 }
 0x211   :  { %1318 = vmatmul.mubr.f32.gmra.mrb[28].mxu1 %v1140_v13  ;;  %v1142_v15 = vmul.f32 %v1110_v33, %v310_v59 }
 0x212   :  { %1322 = vmatprep.mubr.f32.mxu1 %v1143_v27 }
 0x215   :  { %1323 = vmatmul.mubr.f32.gmra.mrb[30].mxu1 %v1142_v15 }
 0x269   :  { %v1395_v23 = vpop.f32.mrb[0].mxu1 }
 0x26a   :  { %v1396_v60 = vpop.f32.mrb[1].mxu1 }
 0x26b   :  { %v1397_v7 = vadd.f32 %v1396_v60, %v1395_v23 }
 0x26d   :  { %v1250_v58 = vadd.f32 %v1397_v7, %v2595_v56 }
 0x26f   :  { %1328 = vst [vmem:[#allocation8] sm:$0xff] %v1250_v58 }
 0x273   :  { %v1398_v48 = vpop.f32.mrb[2].mxu1 }
 0x274   :  { %v1399_v43 = vpop.f32.mrb[3].mxu1 }
 0x275   :  { %v1400_v8 = vadd.f32 %v1399_v43, %v1398_v48 }
 0x277   :  { %v1255_v37 = vadd.f32 %v1400_v8, %v2595_v56 }
 0x279   :  { %1329 = vst [vmem:[#allocation8 + $0x8] sm:$0xff] %v1255_v37 }
 0x282   :  { %v1401_v25 = vpop.f32.mrb[4].mxu1 }
 0x283   :  { %v1402_v31 = vpop.f32.mrb[5].mxu1 }
 0x284   :  { %v1403_v42 = vadd.f32 %v1402_v31, %v1401_v25 }
 0x286   :  { %v1260_v47 = vadd.f32 %v1403_v42, %v2595_v56 }
 0x288   :  { %1330 = vst [vmem:[#allocation8 + $0x10] sm:$0xff] %v1260_v47 }
 0x289   :  { %v1404_v17 = vpop.f32.mrb[6].mxu1 }
 0x28a   :  { %v1405_v4 = vpop.f32.mrb[7].mxu1 }
 0x28b   :  { %v1406_v2 = vadd.f32 %v1405_v4, %v1404_v17 }
 0x28d   :  { %v1265_v45 = vadd.f32 %v1406_v2, %v2595_v56 }
 0x28e   :  { %v1407_v36 = vpop.f32.mrb[8].mxu1 }
 0x28f   :  { %1331 = vst [vmem:[#allocation8 + $0x18] sm:$0xff] %v1265_v45  ;;  %v1408_v57 = vpop.f32.mrb[9].mxu1 }
 0x290   :  { %v1409_v11 = vadd.f32 %v1408_v57, %v1407_v36 }
 0x292   :  { %v1270_v1 = vadd.f32 %v1409_v11, %v2595_v56 }
 0x294   :  { %1332 = vst [vmem:[#allocation8 + $0x20] sm:$0xff] %v1270_v1  ;;  %v1410_v3 = vpop.f32.mrb[10].mxu1 }
 0x295   :  { %v1411_v34 = vpop.f32.mrb[11].mxu1 }
 0x296   :  { %v1412_v19 = vadd.f32 %v1411_v34, %v1410_v3 }
 0x298   :  { %v1275_v26 = vadd.f32 %v1412_v19, %v2595_v56 }
 0x29a   :  { %1333 = vst [vmem:[#allocation8 + $0x28] sm:$0xff] %v1275_v26 }
 0x2a4   :  { %v1413_v44 = vpop.f32.mrb[12].mxu1 }
 0x2a5   :  { %v1414_v32 = vpop.f32.mrb[13].mxu1 }
 0x2a6   :  { %v1415_v61 = vadd.f32 %v1414_v32, %v1413_v44 }
 0x2a8   :  { %v1280_v38 = vadd.f32 %v1415_v61, %v2595_v56 }
 0x2a9   :  { %v1416_v35 = vpop.f32.mrb[14].mxu1 }
 0x2aa   :  { %v1417_v40 = vpop.f32.mrb[15].mxu1  ;;  %1334 = vst [vmem:[#allocation8 + $0x30] sm:$0xff] %v1280_v38 }
 0x2ab   :  { %v1418_v51 = vadd.f32 %v1417_v40, %v1416_v35 }
 0x2ad   :  { %v1285_v50 = vadd.f32 %v1418_v51, %v2595_v56 }
 0x2ae   :  { %v1419_v53 = vpop.f32.mrb[16].mxu1 }
 0x2af   :  { %1335 = vst [vmem:[#allocation8 + $0x38] sm:$0xff] %v1285_v50  ;;  %v1420_v20 = vpop.f32.mrb[17].mxu1 }
 0x2b0   :  { %v1421_v63 = vadd.f32 %v1420_v20, %v1419_v53 }
 0x2b2   :  { %v1290_v30 = vadd.f32 %v1421_v63, %v2595_v56 }
 0x2b4   :  { %1336 = vst [vmem:[#allocation8 + $0x40] sm:$0xff] %v1290_v30 }
 0x2b5   :  { %v1422_v5 = vpop.f32.mrb[18].mxu1 }
 0x2b6   :  { %v1423_v39 = vpop.f32.mrb[19].mxu1 }
 0x2b7   :  { %v1424_v18 = vadd.f32 %v1423_v39, %v1422_v5 }
 0x2b9   :  { %v1295_v0 = vadd.f32 %v1424_v18, %v2595_v56 }
 0x2bb   :  { %1337 = vst [vmem:[#allocation8 + $0x48] sm:$0xff] %v1295_v0 }
 0x2c5   :  { %v1425_v12 = vpop.f32.mrb[20].mxu1 }
 0x2c6   :  { %v1426_v22 = vpop.f32.mrb[21].mxu1 }
 0x2c7   :  { %v1427_v54 = vadd.f32 %v1426_v22, %v1425_v12 }
 0x2c9   :  { %v1300_v14 = vadd.f32 %v1427_v54, %v2595_v56  ;;  %v1428_v41 = vpop.f32.mrb[22].mxu1 }
 0x2ca   :  { %v1429_v16 = vpop.f32.mrb[23].mxu1 }
 0x2cb   :  { %1338 = vst [vmem:[#allocation8 + $0x50] sm:$0xff] %v1300_v14  ;;  %v1430_v49 = vadd.f32 %v1429_v16, %v1428_v41 }
 0x2cd   :  { %v1305_v62 = vadd.f32 %v1430_v49, %v2595_v56  ;;  %v1431_v46 = vpop.f32.mrb[24].mxu1 }
 0x2ce   :  { %v1432_v21 = vpop.f32.mrb[25].mxu1 }
 0x2cf   :  { %1339 = vst [vmem:[#allocation8 + $0x58] sm:$0xff] %v1305_v62  ;;  %v1433_v52 = vadd.f32 %v1432_v21, %v1431_v46 }
 0x2d1   :  { %v1310_v24 = vadd.f32 %v1433_v52, %v2595_v56 }
 0x2d3   :  { %1340 = vst [vmem:[#allocation8 + $0x60] sm:$0xff] %v1310_v24 }
 0x2d7   :  { %v1434_v6 = vpop.f32.mrb[26].mxu1 }
 0x2d8   :  { %v1435_v29 = vpop.f32.mrb[27].mxu1 }
 0x2d9   :  { %v1436_v28 = vadd.f32 %v1435_v29, %v1434_v6 }
 0x2db   :  { %v1315_v55 = vadd.f32 %v1436_v28, %v2595_v56 }
 0x2dd   :  { %1341 = vst [vmem:[#allocation8 + $0x68] sm:$0xff] %v1315_v55 }
 0x2e4   :  { %v1437_v10 = vpop.f32.mrb[28].mxu1 }
 0x2e5   :  { %v1438_v13 = vpop.f32.mrb[29].mxu1 }
 0x2e6   :  { %v1439_v27 = vadd.f32 %v1438_v13, %v1437_v10 }
 0x2e8   :  { %v1320_v33 = vadd.f32 %v1439_v27, %v2595_v56  ;;  %v1440_v9 = vpop.f32.mrb[30].mxu1 }
 0x2e9   :  { %v1441_v59 = vpop.f32.mrb[31].mxu1 }
 0x2ea   :  { %1342 = vst [vmem:[#allocation8 + $0x70] sm:$0xff] %v1320_v33  ;;  %v1442_v15 = vadd.f32 %v1441_v59, %v1440_v9 }
 0x2ec   :  { %v1325_v23 = vadd.f32 %v1442_v15, %v2595_v56 }
 0x2ee   :  { %1343 = vst [vmem:[#allocation8 + $0x78] sm:$0xff] %v1325_v23 }
 0x2ef   :  { %1721 = shalt.err (!%p1718_p0)
}
 0x2f0   :  { %s1722_s8 = scalar_lea.hbm %s2632_s4, 2048 }
 0x2f1   :  { %p1723_p1 = scmp.ne.s32.totalorder %s2632_s4, %s1722_s8  ;;  %p1726_p2 = scmp.lt.u32.totalorder %s1722_s8, %s2632_s4 }
 0x2f3   :  { %p1728_p3 = pnand %p1726_p2, %p1723_p1 }
 0x2f5   :  { %1731 = shalt.err (!%p1728_p3)
}
 0x2f6   :  { %1355 = dma.vmem_to_hbm [thread:$0]  %s1350_s30, 2048, %s2632_s4, [#allocation4], %s1742_s1, %s1742_s1, %s1743_s13  }
 0x2f7   :  { %1736 = dma.done.wait [#allocation4], 2048  }
 0x2f8   :  { %1737 = vsyncadd [#allocation4], 4294965248 }
 0x2f9   :  { %1359 = vsyncpa [#allocation3], 1 }
 0x2fa   :  { %1360 = vsyncpa [#allocation6], 1 }
 0x2fb   :  { %1361 = vsyncpa [#allocation4], 1 }

</bundles_post_ra>
